<compile_context>
chip_gen: v5e
topology: v5e:2x2
jax: 0.10.0
libtpu: 0.0.40
codegen_flags: <defaults>
</compile_context>

<pallas_src>
import jax
import jax.numpy as jnp
from jax import lax
from jax.experimental import pallas as pl
from jax.experimental.pallas import tpu as pltpu

HIDDEN_SIZE = 4
INPUT_SIZE = 1
NUM_CLASSES = 1
NUM_LAYERS = 1
FC1_SIZE = 124
FC1_PAD = 128  # lane-dense width (multiple of 128)


def lstm1_kernel(x_ref, lstm_ref, fc1_ref, fc2_ref, out_ref):
    """x_ref:    (B, T, I)               batch_first input
       lstm_ref: (I + H + 1, 4H)         rows = [W_ih^T ; W_hh^T ; (b_ih + b_hh)]
       fc1_ref:  (H + 1, F1P)            rows = [W_fc1^T ; b_fc1]   (zero-padded to F1P)
       fc2_ref:  (F1P + 1, C)            rows = [W_fc2^T ; b_fc2]   (zero-padded rows)
       out_ref:  (B, C)"""
    B, T, I = x_ref.shape
    H = lstm_ref.shape[1] // 4
    F1 = fc1_ref.shape[1]

    # Static sublane slices of the packed parameter panels (cheap, loaded once).
    wih = lstm_ref[0:I, :]                  # (I, 4H)
    whh = lstm_ref[I:I + H, :]              # (H, 4H)
    b = lstm_ref[I + H:I + H + 1, :]        # (1, 4H)

    # Hoisted input projection: only the h-recurrence stays serial.
    x = x_ref[...]                                                   # (B, T, I)
    xproj = lax.dot_general(
        x, wih, (((2,), (0,)), ((), ())),
        preferred_element_type=jnp.float32) + b                      # (B, T, 4H)

    h = jnp.zeros((B, H), jnp.float32)
    c = jnp.zeros((B, H), jnp.float32)

    # Statically unrolled recurrence (T is small and fixed).
    for t in range(T):
        gates = xproj[:, t, :]                                       # (B, 4H)
        # h @ W_hh^T as H unrolled VPU broadcast mul-adds (avoids tiny MXU op).
        for k in range(H):
            gates = gates + h[:, k:k + 1] * whh[k:k + 1, :]
        sig = jax.nn.sigmoid(gates)      # one full-vreg EUP pass (i, f, o live here)
        tnh = jnp.tanh(gates)            # one full-vreg EUP pass (g lives here)
        i_g = sig[:, 0 * H:1 * H]
        f_g = sig[:, 1 * H:2 * H]
        g_g = tnh[:, 2 * H:3 * H]
        o_g = sig[:, 3 * H:4 * H]
        c = f_g * c + i_g * g_g
        h = o_g * jnp.tanh(c)

    # hn.view(-1, H) -> relu -> fc_1 -> relu -> fc   (FC1 lanes padded with zeros)
    w1 = fc1_ref[0:H, :]                    # (H, F1)
    b1 = fc1_ref[H:H + 1, :]                # (1, F1)
    w2 = fc2_ref[0:F1, :]                   # (F1, C)
    b2 = fc2_ref[F1:F1 + 1, :]              # (1, C)

    z = jnp.maximum(h, 0.0)
    z1 = jnp.dot(z, w1, preferred_element_type=jnp.float32) + b1
    z1 = jnp.maximum(z1, 0.0)
    out_ref[...] = jnp.dot(z1, w2, preferred_element_type=jnp.float32) + b2


def init_params(key, input_size=INPUT_SIZE, hidden_size=HIDDEN_SIZE,
                fc1_size=FC1_SIZE, num_classes=NUM_CLASSES):
    """Deterministic param init mimicking PyTorch's uniform(-1/sqrt(fan), 1/sqrt(fan))."""
    ks = jax.random.split(key, 8)
    s_lstm = 1.0 / jnp.sqrt(hidden_size)
    s_fc1 = 1.0 / jnp.sqrt(hidden_size)
    s_fc2 = 1.0 / jnp.sqrt(fc1_size)
    return dict(
        w_ih=jax.random.uniform(ks[0], (4 * hidden_size, input_size), jnp.float32,
                                -s_lstm, s_lstm),
        w_hh=jax.random.uniform(ks[1], (4 * hidden_size, hidden_size), jnp.float32,
                                -s_lstm, s_lstm),
        b_ih=jax.random.uniform(ks[2], (4 * hidden_size,), jnp.float32, -s_lstm, s_lstm),
        b_hh=jax.random.uniform(ks[3], (4 * hidden_size,), jnp.float32, -s_lstm, s_lstm),
        w_fc1=jax.random.uniform(ks[4], (fc1_size, hidden_size), jnp.float32,
                                 -s_fc1, s_fc1),
        b_fc1=jax.random.uniform(ks[5], (fc1_size,), jnp.float32, -s_fc1, s_fc1),
        w_fc2=jax.random.uniform(ks[6], (num_classes, fc1_size), jnp.float32,
                                 -s_fc2, s_fc2),
        b_fc2=jax.random.uniform(ks[7], (num_classes,), jnp.float32, -s_fc2, s_fc2),
    )


def lstm1_forward(x, params):
    """x: (B, T, input_size) float32, batch_first like the PyTorch module.
    Returns (B, num_classes)."""
    B, T, I = x.shape
    H = params["w_hh"].shape[1]
    F1 = params["w_fc1"].shape[0]
    C = params["w_fc2"].shape[0]
    F1P = ((F1 + 127) // 128) * 128          # 124 -> 128 lane-dense

    # Pack parameters into 3 panels (fewer VMEM inputs => fewer DMA descriptors).
    lstm_panel = jnp.concatenate(
        [params["w_ih"].T,                                    # (I, 4H)
         params["w_hh"].T,                                    # (H, 4H)
         (params["b_ih"] + params["b_hh"]).reshape(1, 4 * H)  # (1, 4H)
         ], axis=0).astype(jnp.float32)                       # (I+H+1, 4H)

    w1_pad = jnp.zeros((H, F1P), jnp.float32).at[:, :F1].set(params["w_fc1"].T)
    b1_pad = jnp.zeros((1, F1P), jnp.float32).at[:, :F1].set(params["b_fc1"][None, :])
    fc1_panel = jnp.concatenate([w1_pad, b1_pad], axis=0)     # (H+1, F1P)

    w2_pad = jnp.zeros((F1P, C), jnp.float32).at[:F1, :].set(params["w_fc2"].T)
    b2 = params["b_fc2"].reshape(1, C).astype(jnp.float32)
    fc2_panel = jnp.concatenate([w2_pad, b2], axis=0)         # (F1P+1, C)

    vmem = pl.BlockSpec(memory_space=pltpu.MemorySpace.VMEM)
    out = pl.pallas_call(
        lstm1_kernel,
        out_shape=jax.ShapeDtypeStruct((B, C), jnp.float32),
        in_specs=[vmem, vmem, vmem, vmem],
        out_specs=vmem,
    )(x.astype(jnp.float32), lstm_panel, fc1_panel, fc2_panel)
    return out


def lstm1_reference(x, params):
    """Pure-JAX reference of the same forward pass (for correctness check)."""
    B, T, I = x.shape
    H = params["w_hh"].shape[1]
    wih_t = params["w_ih"].T
    whh_t = params["w_hh"].T
    b = params["b_ih"] + params["b_hh"]

    def step(carry, xt):
        h, c = carry
        gates = xt @ wih_t + h @ whh_t + b
        i_g = jax.nn.sigmoid(gates[:, 0 * H:1 * H])
        f_g = jax.nn.sigmoid(gates[:, 1 * H:2 * H])
        g_g = jnp.tanh(gates[:, 2 * H:3 * H])
        o_g = jax.nn.sigmoid(gates[:, 3 * H:4 * H])
        c_new = f_g * c + i_g * g_g
        h_new = o_g * jnp.tanh(c_new)
        return (h_new, c_new), None

    (h_T, _), _ = lax.scan(step, (jnp.zeros((B, H)), jnp.zeros((B, H))),
                           jnp.transpose(x, (1, 0, 2)))
    z = jax.nn.relu(h_T)
    z1 = jax.nn.relu(z @ params["w_fc1"].T + params["b_fc1"])
    return z1 @ params["w_fc2"].T + params["b_fc2"]


if __name__ == "__main__":
    key = jax.random.PRNGKey(0)
    k_param, k_x = jax.random.split(key)

    B, T = 2, 8
    params = init_params(k_param)
    x = jax.random.normal(k_x, (B, T, INPUT_SIZE), jnp.float32)

    out = lstm1_forward(x, params)
    out = jax.block_until_ready(out)

    ref = lstm1_reference(x, params)
    assert out.shape == (B, NUM_CLASSES)
    assert jnp.allclose(out, ref, atol=1e-5, rtol=1e-5), (out, ref)

    print("KERNEL_OK")
</pallas_src>

<mosaic_0001>
module attributes {stable_mosaic.version = 11 : i64} {
  func.func @lstm1_kernel(%arg0: memref<2x8x1xf32, #tpu.memory_space<vmem>>, %arg1: memref<6x16xf32, #tpu.memory_space<vmem>>, %arg2: memref<5x128xf32, #tpu.memory_space<vmem>>, %arg3: memref<129x1xf32, #tpu.memory_space<vmem>>, %arg4: memref<2x1xf32, #tpu.memory_space<vmem>>) attributes {dimension_semantics = [], scalar_prefetch = 0 : i64, scratch_operands = 0 : i64, tpu.core_type = #tpu.core_type<tc>} {
    %c0 = arith.constant 0 : index
    %c0_0 = arith.constant 0 : index
    %0 = vector.load %arg1[%c0, %c0_0] : memref<6x16xf32, #tpu.memory_space<vmem>>, vector<1x16xf32>
    %c1 = arith.constant 1 : index
    %c0_1 = arith.constant 0 : index
    %1 = vector.load %arg1[%c1, %c0_1] : memref<6x16xf32, #tpu.memory_space<vmem>>, vector<4x16xf32>
    %c5 = arith.constant 5 : index
    %c0_2 = arith.constant 0 : index
    %2 = vector.load %arg1[%c5, %c0_2] : memref<6x16xf32, #tpu.memory_space<vmem>>, vector<1x16xf32>
    %c0_3 = arith.constant 0 : index
    %c0_4 = arith.constant 0 : index
    %c0_5 = arith.constant 0 : index
    %3 = vector.load %arg0[%c0_3, %c0_4, %c0_5] : memref<2x8x1xf32, #tpu.memory_space<vmem>>, vector<2x8x1xf32>
    %cst = arith.constant dense<0.000000e+00> : vector<2x8x16xf32>
    %4 = tpu.matmul %3, %0, %cst {dimension_numbers = #tpu.dot_dimension_numbers<[2], [0], [0, 1], [1], [0, 0, 0, 1, 1, 1], [], []>} : vector<2x8x1xf32>, vector<1x16xf32>, vector<2x8x16xf32> -> vector<2x8x16xf32>
    %5 = vector.shape_cast %2 : vector<1x16xf32> to vector<1x1x16xf32>
    %6 = vector.broadcast %5 : vector<1x1x16xf32> to vector<2x8x16xf32>
    %7 = arith.addf %4, %6 : vector<2x8x16xf32>
    %cst_6 = arith.constant 0.000000e+00 : f32
    %8 = vector.broadcast %cst_6 : f32 to vector<2x4xf32>
    %cst_7 = arith.constant 0.000000e+00 : f32
    %9 = vector.broadcast %cst_7 : f32 to vector<2x4xf32>
    %10 = vector.extract_strided_slice %7 {offsets = [0, 0, 0], sizes = [2, 1, 16], strides = [1, 1, 1]} : vector<2x8x16xf32> to vector<2x1x16xf32>
    %11 = vector.shape_cast %10 : vector<2x1x16xf32> to vector<2x16xf32>
    %12 = vector.extract_strided_slice %8 {offsets = [0, 0], sizes = [2, 1], strides = [1, 1]} : vector<2x4xf32> to vector<2x1xf32>
    %13 = vector.extract_strided_slice %1 {offsets = [0, 0], sizes = [1, 16], strides = [1, 1]} : vector<4x16xf32> to vector<1x16xf32>
    %14 = vector.broadcast %12 : vector<2x1xf32> to vector<2x16xf32>
    %15 = vector.broadcast %13 : vector<1x16xf32> to vector<2x16xf32>
    %16 = arith.mulf %14, %15 : vector<2x16xf32>
    %17 = arith.addf %11, %16 : vector<2x16xf32>
    %18 = vector.extract_strided_slice %8 {offsets = [0, 1], sizes = [2, 1], strides = [1, 1]} : vector<2x4xf32> to vector<2x1xf32>
    %19 = vector.extract_strided_slice %1 {offsets = [1, 0], sizes = [1, 16], strides = [1, 1]} : vector<4x16xf32> to vector<1x16xf32>
    %20 = vector.broadcast %18 : vector<2x1xf32> to vector<2x16xf32>
    %21 = vector.broadcast %19 : vector<1x16xf32> to vector<2x16xf32>
    %22 = arith.mulf %20, %21 : vector<2x16xf32>
    %23 = arith.addf %17, %22 : vector<2x16xf32>
    %24 = vector.extract_strided_slice %8 {offsets = [0, 2], sizes = [2, 1], strides = [1, 1]} : vector<2x4xf32> to vector<2x1xf32>
    %25 = vector.extract_strided_slice %1 {offsets = [2, 0], sizes = [1, 16], strides = [1, 1]} : vector<4x16xf32> to vector<1x16xf32>
    %26 = vector.broadcast %24 : vector<2x1xf32> to vector<2x16xf32>
    %27 = vector.broadcast %25 : vector<1x16xf32> to vector<2x16xf32>
    %28 = arith.mulf %26, %27 : vector<2x16xf32>
    %29 = arith.addf %23, %28 : vector<2x16xf32>
    %30 = vector.extract_strided_slice %8 {offsets = [0, 3], sizes = [2, 1], strides = [1, 1]} : vector<2x4xf32> to vector<2x1xf32>
    %31 = vector.extract_strided_slice %1 {offsets = [3, 0], sizes = [1, 16], strides = [1, 1]} : vector<4x16xf32> to vector<1x16xf32>
    %32 = vector.broadcast %30 : vector<2x1xf32> to vector<2x16xf32>
    %33 = vector.broadcast %31 : vector<1x16xf32> to vector<2x16xf32>
    %34 = arith.mulf %32, %33 : vector<2x16xf32>
    %35 = arith.addf %29, %34 : vector<2x16xf32>
    %36 = arith.negf %35 : vector<2x16xf32>
    %37 = math.exp %36 : vector<2x16xf32>
    %cst_8 = arith.constant 1.000000e+00 : f32
    %38 = vector.broadcast %cst_8 : f32 to vector<2x16xf32>
    %39 = arith.addf %38, %37 : vector<2x16xf32>
    %40 = arith.divf %38, %39 : vector<2x16xf32>
    %41 = math.tanh %35 : vector<2x16xf32>
    %42 = vector.extract_strided_slice %40 {offsets = [0, 0], sizes = [2, 4], strides = [1, 1]} : vector<2x16xf32> to vector<2x4xf32>
    %43 = vector.extract_strided_slice %40 {offsets = [0, 4], sizes = [2, 4], strides = [1, 1]} : vector<2x16xf32> to vector<2x4xf32>
    %44 = vector.extract_strided_slice %41 {offsets = [0, 8], sizes = [2, 4], strides = [1, 1]} : vector<2x16xf32> to vector<2x4xf32>
    %45 = vector.extract_strided_slice %40 {offsets = [0, 12], sizes = [2, 4], strides = [1, 1]} : vector<2x16xf32> to vector<2x4xf32>
    %46 = arith.mulf %43, %9 : vector<2x4xf32>
    %47 = arith.mulf %42, %44 : vector<2x4xf32>
    %48 = arith.addf %46, %47 : vector<2x4xf32>
    %49 = math.tanh %48 : vector<2x4xf32>
    %50 = arith.mulf %45, %49 : vector<2x4xf32>
    %51 = vector.extract_strided_slice %7 {offsets = [0, 1, 0], sizes = [2, 1, 16], strides = [1, 1, 1]} : vector<2x8x16xf32> to vector<2x1x16xf32>
    %52 = vector.shape_cast %51 : vector<2x1x16xf32> to vector<2x16xf32>
    %53 = vector.extract_strided_slice %50 {offsets = [0, 0], sizes = [2, 1], strides = [1, 1]} : vector<2x4xf32> to vector<2x1xf32>
    %54 = vector.extract_strided_slice %1 {offsets = [0, 0], sizes = [1, 16], strides = [1, 1]} : vector<4x16xf32> to vector<1x16xf32>
    %55 = vector.broadcast %53 : vector<2x1xf32> to vector<2x16xf32>
    %56 = vector.broadcast %54 : vector<1x16xf32> to vector<2x16xf32>
    %57 = arith.mulf %55, %56 : vector<2x16xf32>
    %58 = arith.addf %52, %57 : vector<2x16xf32>
    %59 = vector.extract_strided_slice %50 {offsets = [0, 1], sizes = [2, 1], strides = [1, 1]} : vector<2x4xf32> to vector<2x1xf32>
    %60 = vector.extract_strided_slice %1 {offsets = [1, 0], sizes = [1, 16], strides = [1, 1]} : vector<4x16xf32> to vector<1x16xf32>
    %61 = vector.broadcast %59 : vector<2x1xf32> to vector<2x16xf32>
    %62 = vector.broadcast %60 : vector<1x16xf32> to vector<2x16xf32>
    %63 = arith.mulf %61, %62 : vector<2x16xf32>
    %64 = arith.addf %58, %63 : vector<2x16xf32>
    %65 = vector.extract_strided_slice %50 {offsets = [0, 2], sizes = [2, 1], strides = [1, 1]} : vector<2x4xf32> to vector<2x1xf32>
    %66 = vector.extract_strided_slice %1 {offsets = [2, 0], sizes = [1, 16], strides = [1, 1]} : vector<4x16xf32> to vector<1x16xf32>
    %67 = vector.broadcast %65 : vector<2x1xf32> to vector<2x16xf32>
    %68 = vector.broadcast %66 : vector<1x16xf32> to vector<2x16xf32>
    %69 = arith.mulf %67, %68 : vector<2x16xf32>
    %70 = arith.addf %64, %69 : vector<2x16xf32>
    %71 = vector.extract_strided_slice %50 {offsets = [0, 3], sizes = [2, 1], strides = [1, 1]} : vector<2x4xf32> to vector<2x1xf32>
    %72 = vector.extract_strided_slice %1 {offsets = [3, 0], sizes = [1, 16], strides = [1, 1]} : vector<4x16xf32> to vector<1x16xf32>
    %73 = vector.broadcast %71 : vector<2x1xf32> to vector<2x16xf32>
    %74 = vector.broadcast %72 : vector<1x16xf32> to vector<2x16xf32>
    %75 = arith.mulf %73, %74 : vector<2x16xf32>
    %76 = arith.addf %70, %75 : vector<2x16xf32>
    %77 = arith.negf %76 : vector<2x16xf32>
    %78 = math.exp %77 : vector<2x16xf32>
    %cst_9 = arith.constant 1.000000e+00 : f32
    %79 = vector.broadcast %cst_9 : f32 to vector<2x16xf32>
    %80 = arith.addf %79, %78 : vector<2x16xf32>
    %81 = arith.divf %79, %80 : vector<2x16xf32>
    %82 = math.tanh %76 : vector<2x16xf32>
    %83 = vector.extract_strided_slice %81 {offsets = [0, 0], sizes = [2, 4], strides = [1, 1]} : vector<2x16xf32> to vector<2x4xf32>
    %84 = vector.extract_strided_slice %81 {offsets = [0, 4], sizes = [2, 4], strides = [1, 1]} : vector<2x16xf32> to vector<2x4xf32>
    %85 = vector.extract_strided_slice %82 {offsets = [0, 8], sizes = [2, 4], strides = [1, 1]} : vector<2x16xf32> to vector<2x4xf32>
    %86 = vector.extract_strided_slice %81 {offsets = [0, 12], sizes = [2, 4], strides = [1, 1]} : vector<2x16xf32> to vector<2x4xf32>
    %87 = arith.mulf %84, %48 : vector<2x4xf32>
    %88 = arith.mulf %83, %85 : vector<2x4xf32>
    %89 = arith.addf %87, %88 : vector<2x4xf32>
    %90 = math.tanh %89 : vector<2x4xf32>
    %91 = arith.mulf %86, %90 : vector<2x4xf32>
    %92 = vector.extract_strided_slice %7 {offsets = [0, 2, 0], sizes = [2, 1, 16], strides = [1, 1, 1]} : vector<2x8x16xf32> to vector<2x1x16xf32>
    %93 = vector.shape_cast %92 : vector<2x1x16xf32> to vector<2x16xf32>
    %94 = vector.extract_strided_slice %91 {offsets = [0, 0], sizes = [2, 1], strides = [1, 1]} : vector<2x4xf32> to vector<2x1xf32>
    %95 = vector.extract_strided_slice %1 {offsets = [0, 0], sizes = [1, 16], strides = [1, 1]} : vector<4x16xf32> to vector<1x16xf32>
    %96 = vector.broadcast %94 : vector<2x1xf32> to vector<2x16xf32>
    %97 = vector.broadcast %95 : vector<1x16xf32> to vector<2x16xf32>
    %98 = arith.mulf %96, %97 : vector<2x16xf32>
    %99 = arith.addf %93, %98 : vector<2x16xf32>
    %100 = vector.extract_strided_slice %91 {offsets = [0, 1], sizes = [2, 1], strides = [1, 1]} : vector<2x4xf32> to vector<2x1xf32>
    %101 = vector.extract_strided_slice %1 {offsets = [1, 0], sizes = [1, 16], strides = [1, 1]} : vector<4x16xf32> to vector<1x16xf32>
    %102 = vector.broadcast %100 : vector<2x1xf32> to vector<2x16xf32>
    %103 = vector.broadcast %101 : vector<1x16xf32> to vector<2x16xf32>
    %104 = arith.mulf %102, %103 : vector<2x16xf32>
    %105 = arith.addf %99, %104 : vector<2x16xf32>
    %106 = vector.extract_strided_slice %91 {offsets = [0, 2], sizes = [2, 1], strides = [1, 1]} : vector<2x4xf32> to vector<2x1xf32>
    %107 = vector.extract_strided_slice %1 {offsets = [2, 0], sizes = [1, 16], strides = [1, 1]} : vector<4x16xf32> to vector<1x16xf32>
    %108 = vector.broadcast %106 : vector<2x1xf32> to vector<2x16xf32>
    %109 = vector.broadcast %107 : vector<1x16xf32> to vector<2x16xf32>
    %110 = arith.mulf %108, %109 : vector<2x16xf32>
    %111 = arith.addf %105, %110 : vector<2x16xf32>
    %112 = vector.extract_strided_slice %91 {offsets = [0, 3], sizes = [2, 1], strides = [1, 1]} : vector<2x4xf32> to vector<2x1xf32>
    %113 = vector.extract_strided_slice %1 {offsets = [3, 0], sizes = [1, 16], strides = [1, 1]} : vector<4x16xf32> to vector<1x16xf32>
    %114 = vector.broadcast %112 : vector<2x1xf32> to vector<2x16xf32>
    %115 = vector.broadcast %113 : vector<1x16xf32> to vector<2x16xf32>
    %116 = arith.mulf %114, %115 : vector<2x16xf32>
    %117 = arith.addf %111, %116 : vector<2x16xf32>
    %118 = arith.negf %117 : vector<2x16xf32>
    %119 = math.exp %118 : vector<2x16xf32>
    %cst_10 = arith.constant 1.000000e+00 : f32
    %120 = vector.broadcast %cst_10 : f32 to vector<2x16xf32>
    %121 = arith.addf %120, %119 : vector<2x16xf32>
    %122 = arith.divf %120, %121 : vector<2x16xf32>
    %123 = math.tanh %117 : vector<2x16xf32>
    %124 = vector.extract_strided_slice %122 {offsets = [0, 0], sizes = [2, 4], strides = [1, 1]} : vector<2x16xf32> to vector<2x4xf32>
    %125 = vector.extract_strided_slice %122 {offsets = [0, 4], sizes = [2, 4], strides = [1, 1]} : vector<2x16xf32> to vector<2x4xf32>
    %126 = vector.extract_strided_slice %123 {offsets = [0, 8], sizes = [2, 4], strides = [1, 1]} : vector<2x16xf32> to vector<2x4xf32>
    %127 = vector.extract_strided_slice %122 {offsets = [0, 12], sizes = [2, 4], strides = [1, 1]} : vector<2x16xf32> to vector<2x4xf32>
    %128 = arith.mulf %125, %89 : vector<2x4xf32>
    %129 = arith.mulf %124, %126 : vector<2x4xf32>
    %130 = arith.addf %128, %129 : vector<2x4xf32>
    %131 = math.tanh %130 : vector<2x4xf32>
    %132 = arith.mulf %127, %131 : vector<2x4xf32>
    %133 = vector.extract_strided_slice %7 {offsets = [0, 3, 0], sizes = [2, 1, 16], strides = [1, 1, 1]} : vector<2x8x16xf32> to vector<2x1x16xf32>
    %134 = vector.shape_cast %133 : vector<2x1x16xf32> to vector<2x16xf32>
    %135 = vector.extract_strided_slice %132 {offsets = [0, 0], sizes = [2, 1], strides = [1, 1]} : vector<2x4xf32> to vector<2x1xf32>
    %136 = vector.extract_strided_slice %1 {offsets = [0, 0], sizes = [1, 16], strides = [1, 1]} : vector<4x16xf32> to vector<1x16xf32>
    %137 = vector.broadcast %135 : vector<2x1xf32> to vector<2x16xf32>
    %138 = vector.broadcast %136 : vector<1x16xf32> to vector<2x16xf32>
    %139 = arith.mulf %137, %138 : vector<2x16xf32>
    %140 = arith.addf %134, %139 : vector<2x16xf32>
    %141 = vector.extract_strided_slice %132 {offsets = [0, 1], sizes = [2, 1], strides = [1, 1]} : vector<2x4xf32> to vector<2x1xf32>
    %142 = vector.extract_strided_slice %1 {offsets = [1, 0], sizes = [1, 16], strides = [1, 1]} : vector<4x16xf32> to vector<1x16xf32>
    %143 = vector.broadcast %141 : vector<2x1xf32> to vector<2x16xf32>
    %144 = vector.broadcast %142 : vector<1x16xf32> to vector<2x16xf32>
    %145 = arith.mulf %143, %144 : vector<2x16xf32>
    %146 = arith.addf %140, %145 : vector<2x16xf32>
    %147 = vector.extract_strided_slice %132 {offsets = [0, 2], sizes = [2, 1], strides = [1, 1]} : vector<2x4xf32> to vector<2x1xf32>
    %148 = vector.extract_strided_slice %1 {offsets = [2, 0], sizes = [1, 16], strides = [1, 1]} : vector<4x16xf32> to vector<1x16xf32>
    %149 = vector.broadcast %147 : vector<2x1xf32> to vector<2x16xf32>
    %150 = vector.broadcast %148 : vector<1x16xf32> to vector<2x16xf32>
    %151 = arith.mulf %149, %150 : vector<2x16xf32>
    %152 = arith.addf %146, %151 : vector<2x16xf32>
    %153 = vector.extract_strided_slice %132 {offsets = [0, 3], sizes = [2, 1], strides = [1, 1]} : vector<2x4xf32> to vector<2x1xf32>
    %154 = vector.extract_strided_slice %1 {offsets = [3, 0], sizes = [1, 16], strides = [1, 1]} : vector<4x16xf32> to vector<1x16xf32>
    %155 = vector.broadcast %153 : vector<2x1xf32> to vector<2x16xf32>
    %156 = vector.broadcast %154 : vector<1x16xf32> to vector<2x16xf32>
    %157 = arith.mulf %155, %156 : vector<2x16xf32>
    %158 = arith.addf %152, %157 : vector<2x16xf32>
    %159 = arith.negf %158 : vector<2x16xf32>
    %160 = math.exp %159 : vector<2x16xf32>
    %cst_11 = arith.constant 1.000000e+00 : f32
    %161 = vector.broadcast %cst_11 : f32 to vector<2x16xf32>
    %162 = arith.addf %161, %160 : vector<2x16xf32>
    %163 = arith.divf %161, %162 : vector<2x16xf32>
    %164 = math.tanh %158 : vector<2x16xf32>
    %165 = vector.extract_strided_slice %163 {offsets = [0, 0], sizes = [2, 4], strides = [1, 1]} : vector<2x16xf32> to vector<2x4xf32>
    %166 = vector.extract_strided_slice %163 {offsets = [0, 4], sizes = [2, 4], strides = [1, 1]} : vector<2x16xf32> to vector<2x4xf32>
    %167 = vector.extract_strided_slice %164 {offsets = [0, 8], sizes = [2, 4], strides = [1, 1]} : vector<2x16xf32> to vector<2x4xf32>
    %168 = vector.extract_strided_slice %163 {offsets = [0, 12], sizes = [2, 4], strides = [1, 1]} : vector<2x16xf32> to vector<2x4xf32>
    %169 = arith.mulf %166, %130 : vector<2x4xf32>
    %170 = arith.mulf %165, %167 : vector<2x4xf32>
    %171 = arith.addf %169, %170 : vector<2x4xf32>
    %172 = math.tanh %171 : vector<2x4xf32>
    %173 = arith.mulf %168, %172 : vector<2x4xf32>
    %174 = vector.extract_strided_slice %7 {offsets = [0, 4, 0], sizes = [2, 1, 16], strides = [1, 1, 1]} : vector<2x8x16xf32> to vector<2x1x16xf32>
    %175 = vector.shape_cast %174 : vector<2x1x16xf32> to vector<2x16xf32>
    %176 = vector.extract_strided_slice %173 {offsets = [0, 0], sizes = [2, 1], strides = [1, 1]} : vector<2x4xf32> to vector<2x1xf32>
    %177 = vector.extract_strided_slice %1 {offsets = [0, 0], sizes = [1, 16], strides = [1, 1]} : vector<4x16xf32> to vector<1x16xf32>
    %178 = vector.broadcast %176 : vector<2x1xf32> to vector<2x16xf32>
    %179 = vector.broadcast %177 : vector<1x16xf32> to vector<2x16xf32>
    %180 = arith.mulf %178, %179 : vector<2x16xf32>
    %181 = arith.addf %175, %180 : vector<2x16xf32>
    %182 = vector.extract_strided_slice %173 {offsets = [0, 1], sizes = [2, 1], strides = [1, 1]} : vector<2x4xf32> to vector<2x1xf32>
    %183 = vector.extract_strided_slice %1 {offsets = [1, 0], sizes = [1, 16], strides = [1, 1]} : vector<4x16xf32> to vector<1x16xf32>
    %184 = vector.broadcast %182 : vector<2x1xf32> to vector<2x16xf32>
    %185 = vector.broadcast %183 : vector<1x16xf32> to vector<2x16xf32>
    %186 = arith.mulf %184, %185 : vector<2x16xf32>
    %187 = arith.addf %181, %186 : vector<2x16xf32>
    %188 = vector.extract_strided_slice %173 {offsets = [0, 2], sizes = [2, 1], strides = [1, 1]} : vector<2x4xf32> to vector<2x1xf32>
    %189 = vector.extract_strided_slice %1 {offsets = [2, 0], sizes = [1, 16], strides = [1, 1]} : vector<4x16xf32> to vector<1x16xf32>
    %190 = vector.broadcast %188 : vector<2x1xf32> to vector<2x16xf32>
    %191 = vector.broadcast %189 : vector<1x16xf32> to vector<2x16xf32>
    %192 = arith.mulf %190, %191 : vector<2x16xf32>
    %193 = arith.addf %187, %192 : vector<2x16xf32>
    %194 = vector.extract_strided_slice %173 {offsets = [0, 3], sizes = [2, 1], strides = [1, 1]} : vector<2x4xf32> to vector<2x1xf32>
    %195 = vector.extract_strided_slice %1 {offsets = [3, 0], sizes = [1, 16], strides = [1, 1]} : vector<4x16xf32> to vector<1x16xf32>
    %196 = vector.broadcast %194 : vector<2x1xf32> to vector<2x16xf32>
    %197 = vector.broadcast %195 : vector<1x16xf32> to vector<2x16xf32>
    %198 = arith.mulf %196, %197 : vector<2x16xf32>
    %199 = arith.addf %193, %198 : vector<2x16xf32>
    %200 = arith.negf %199 : vector<2x16xf32>
    %201 = math.exp %200 : vector<2x16xf32>
    %cst_12 = arith.constant 1.000000e+00 : f32
    %202 = vector.broadcast %cst_12 : f32 to vector<2x16xf32>
    %203 = arith.addf %202, %201 : vector<2x16xf32>
    %204 = arith.divf %202, %203 : vector<2x16xf32>
    %205 = math.tanh %199 : vector<2x16xf32>
    %206 = vector.extract_strided_slice %204 {offsets = [0, 0], sizes = [2, 4], strides = [1, 1]} : vector<2x16xf32> to vector<2x4xf32>
    %207 = vector.extract_strided_slice %204 {offsets = [0, 4], sizes = [2, 4], strides = [1, 1]} : vector<2x16xf32> to vector<2x4xf32>
    %208 = vector.extract_strided_slice %205 {offsets = [0, 8], sizes = [2, 4], strides = [1, 1]} : vector<2x16xf32> to vector<2x4xf32>
    %209 = vector.extract_strided_slice %204 {offsets = [0, 12], sizes = [2, 4], strides = [1, 1]} : vector<2x16xf32> to vector<2x4xf32>
    %210 = arith.mulf %207, %171 : vector<2x4xf32>
    %211 = arith.mulf %206, %208 : vector<2x4xf32>
    %212 = arith.addf %210, %211 : vector<2x4xf32>
    %213 = math.tanh %212 : vector<2x4xf32>
    %214 = arith.mulf %209, %213 : vector<2x4xf32>
    %215 = vector.extract_strided_slice %7 {offsets = [0, 5, 0], sizes = [2, 1, 16], strides = [1, 1, 1]} : vector<2x8x16xf32> to vector<2x1x16xf32>
    %216 = vector.shape_cast %215 : vector<2x1x16xf32> to vector<2x16xf32>
    %217 = vector.extract_strided_slice %214 {offsets = [0, 0], sizes = [2, 1], strides = [1, 1]} : vector<2x4xf32> to vector<2x1xf32>
    %218 = vector.extract_strided_slice %1 {offsets = [0, 0], sizes = [1, 16], strides = [1, 1]} : vector<4x16xf32> to vector<1x16xf32>
    %219 = vector.broadcast %217 : vector<2x1xf32> to vector<2x16xf32>
    %220 = vector.broadcast %218 : vector<1x16xf32> to vector<2x16xf32>
    %221 = arith.mulf %219, %220 : vector<2x16xf32>
    %222 = arith.addf %216, %221 : vector<2x16xf32>
    %223 = vector.extract_strided_slice %214 {offsets = [0, 1], sizes = [2, 1], strides = [1, 1]} : vector<2x4xf32> to vector<2x1xf32>
    %224 = vector.extract_strided_slice %1 {offsets = [1, 0], sizes = [1, 16], strides = [1, 1]} : vector<4x16xf32> to vector<1x16xf32>
    %225 = vector.broadcast %223 : vector<2x1xf32> to vector<2x16xf32>
    %226 = vector.broadcast %224 : vector<1x16xf32> to vector<2x16xf32>
    %227 = arith.mulf %225, %226 : vector<2x16xf32>
    %228 = arith.addf %222, %227 : vector<2x16xf32>
    %229 = vector.extract_strided_slice %214 {offsets = [0, 2], sizes = [2, 1], strides = [1, 1]} : vector<2x4xf32> to vector<2x1xf32>
    %230 = vector.extract_strided_slice %1 {offsets = [2, 0], sizes = [1, 16], strides = [1, 1]} : vector<4x16xf32> to vector<1x16xf32>
    %231 = vector.broadcast %229 : vector<2x1xf32> to vector<2x16xf32>
    %232 = vector.broadcast %230 : vector<1x16xf32> to vector<2x16xf32>
    %233 = arith.mulf %231, %232 : vector<2x16xf32>
    %234 = arith.addf %228, %233 : vector<2x16xf32>
    %235 = vector.extract_strided_slice %214 {offsets = [0, 3], sizes = [2, 1], strides = [1, 1]} : vector<2x4xf32> to vector<2x1xf32>
    %236 = vector.extract_strided_slice %1 {offsets = [3, 0], sizes = [1, 16], strides = [1, 1]} : vector<4x16xf32> to vector<1x16xf32>
    %237 = vector.broadcast %235 : vector<2x1xf32> to vector<2x16xf32>
    %238 = vector.broadcast %236 : vector<1x16xf32> to vector<2x16xf32>
    %239 = arith.mulf %237, %238 : vector<2x16xf32>
    %240 = arith.addf %234, %239 : vector<2x16xf32>
    %241 = arith.negf %240 : vector<2x16xf32>
    %242 = math.exp %241 : vector<2x16xf32>
    %cst_13 = arith.constant 1.000000e+00 : f32
    %243 = vector.broadcast %cst_13 : f32 to vector<2x16xf32>
    %244 = arith.addf %243, %242 : vector<2x16xf32>
    %245 = arith.divf %243, %244 : vector<2x16xf32>
    %246 = math.tanh %240 : vector<2x16xf32>
    %247 = vector.extract_strided_slice %245 {offsets = [0, 0], sizes = [2, 4], strides = [1, 1]} : vector<2x16xf32> to vector<2x4xf32>
    %248 = vector.extract_strided_slice %245 {offsets = [0, 4], sizes = [2, 4], strides = [1, 1]} : vector<2x16xf32> to vector<2x4xf32>
    %249 = vector.extract_strided_slice %246 {offsets = [0, 8], sizes = [2, 4], strides = [1, 1]} : vector<2x16xf32> to vector<2x4xf32>
    %250 = vector.extract_strided_slice %245 {offsets = [0, 12], sizes = [2, 4], strides = [1, 1]} : vector<2x16xf32> to vector<2x4xf32>
    %251 = arith.mulf %248, %212 : vector<2x4xf32>
    %252 = arith.mulf %247, %249 : vector<2x4xf32>
    %253 = arith.addf %251, %252 : vector<2x4xf32>
    %254 = math.tanh %253 : vector<2x4xf32>
    %255 = arith.mulf %250, %254 : vector<2x4xf32>
    %256 = vector.extract_strided_slice %7 {offsets = [0, 6, 0], sizes = [2, 1, 16], strides = [1, 1, 1]} : vector<2x8x16xf32> to vector<2x1x16xf32>
    %257 = vector.shape_cast %256 : vector<2x1x16xf32> to vector<2x16xf32>
    %258 = vector.extract_strided_slice %255 {offsets = [0, 0], sizes = [2, 1], strides = [1, 1]} : vector<2x4xf32> to vector<2x1xf32>
    %259 = vector.extract_strided_slice %1 {offsets = [0, 0], sizes = [1, 16], strides = [1, 1]} : vector<4x16xf32> to vector<1x16xf32>
    %260 = vector.broadcast %258 : vector<2x1xf32> to vector<2x16xf32>
    %261 = vector.broadcast %259 : vector<1x16xf32> to vector<2x16xf32>
    %262 = arith.mulf %260, %261 : vector<2x16xf32>
    %263 = arith.addf %257, %262 : vector<2x16xf32>
    %264 = vector.extract_strided_slice %255 {offsets = [0, 1], sizes = [2, 1], strides = [1, 1]} : vector<2x4xf32> to vector<2x1xf32>
    %265 = vector.extract_strided_slice %1 {offsets = [1, 0], sizes = [1, 16], strides = [1, 1]} : vector<4x16xf32> to vector<1x16xf32>
    %266 = vector.broadcast %264 : vector<2x1xf32> to vector<2x16xf32>
    %267 = vector.broadcast %265 : vector<1x16xf32> to vector<2x16xf32>
    %268 = arith.mulf %266, %267 : vector<2x16xf32>
    %269 = arith.addf %263, %268 : vector<2x16xf32>
    %270 = vector.extract_strided_slice %255 {offsets = [0, 2], sizes = [2, 1], strides = [1, 1]} : vector<2x4xf32> to vector<2x1xf32>
    %271 = vector.extract_strided_slice %1 {offsets = [2, 0], sizes = [1, 16], strides = [1, 1]} : vector<4x16xf32> to vector<1x16xf32>
    %272 = vector.broadcast %270 : vector<2x1xf32> to vector<2x16xf32>
    %273 = vector.broadcast %271 : vector<1x16xf32> to vector<2x16xf32>
    %274 = arith.mulf %272, %273 : vector<2x16xf32>
    %275 = arith.addf %269, %274 : vector<2x16xf32>
    %276 = vector.extract_strided_slice %255 {offsets = [0, 3], sizes = [2, 1], strides = [1, 1]} : vector<2x4xf32> to vector<2x1xf32>
    %277 = vector.extract_strided_slice %1 {offsets = [3, 0], sizes = [1, 16], strides = [1, 1]} : vector<4x16xf32> to vector<1x16xf32>
    %278 = vector.broadcast %276 : vector<2x1xf32> to vector<2x16xf32>
    %279 = vector.broadcast %277 : vector<1x16xf32> to vector<2x16xf32>
    %280 = arith.mulf %278, %279 : vector<2x16xf32>
    %281 = arith.addf %275, %280 : vector<2x16xf32>
    %282 = arith.negf %281 : vector<2x16xf32>
    %283 = math.exp %282 : vector<2x16xf32>
    %cst_14 = arith.constant 1.000000e+00 : f32
    %284 = vector.broadcast %cst_14 : f32 to vector<2x16xf32>
    %285 = arith.addf %284, %283 : vector<2x16xf32>
    %286 = arith.divf %284, %285 : vector<2x16xf32>
    %287 = math.tanh %281 : vector<2x16xf32>
    %288 = vector.extract_strided_slice %286 {offsets = [0, 0], sizes = [2, 4], strides = [1, 1]} : vector<2x16xf32> to vector<2x4xf32>
    %289 = vector.extract_strided_slice %286 {offsets = [0, 4], sizes = [2, 4], strides = [1, 1]} : vector<2x16xf32> to vector<2x4xf32>
    %290 = vector.extract_strided_slice %287 {offsets = [0, 8], sizes = [2, 4], strides = [1, 1]} : vector<2x16xf32> to vector<2x4xf32>
    %291 = vector.extract_strided_slice %286 {offsets = [0, 12], sizes = [2, 4], strides = [1, 1]} : vector<2x16xf32> to vector<2x4xf32>
    %292 = arith.mulf %289, %253 : vector<2x4xf32>
    %293 = arith.mulf %288, %290 : vector<2x4xf32>
    %294 = arith.addf %292, %293 : vector<2x4xf32>
    %295 = math.tanh %294 : vector<2x4xf32>
    %296 = arith.mulf %291, %295 : vector<2x4xf32>
    %297 = vector.extract_strided_slice %7 {offsets = [0, 7, 0], sizes = [2, 1, 16], strides = [1, 1, 1]} : vector<2x8x16xf32> to vector<2x1x16xf32>
    %298 = vector.shape_cast %297 : vector<2x1x16xf32> to vector<2x16xf32>
    %299 = vector.extract_strided_slice %296 {offsets = [0, 0], sizes = [2, 1], strides = [1, 1]} : vector<2x4xf32> to vector<2x1xf32>
    %300 = vector.extract_strided_slice %1 {offsets = [0, 0], sizes = [1, 16], strides = [1, 1]} : vector<4x16xf32> to vector<1x16xf32>
    %301 = vector.broadcast %299 : vector<2x1xf32> to vector<2x16xf32>
    %302 = vector.broadcast %300 : vector<1x16xf32> to vector<2x16xf32>
    %303 = arith.mulf %301, %302 : vector<2x16xf32>
    %304 = arith.addf %298, %303 : vector<2x16xf32>
    %305 = vector.extract_strided_slice %296 {offsets = [0, 1], sizes = [2, 1], strides = [1, 1]} : vector<2x4xf32> to vector<2x1xf32>
    %306 = vector.extract_strided_slice %1 {offsets = [1, 0], sizes = [1, 16], strides = [1, 1]} : vector<4x16xf32> to vector<1x16xf32>
    %307 = vector.broadcast %305 : vector<2x1xf32> to vector<2x16xf32>
    %308 = vector.broadcast %306 : vector<1x16xf32> to vector<2x16xf32>
    %309 = arith.mulf %307, %308 : vector<2x16xf32>
    %310 = arith.addf %304, %309 : vector<2x16xf32>
    %311 = vector.extract_strided_slice %296 {offsets = [0, 2], sizes = [2, 1], strides = [1, 1]} : vector<2x4xf32> to vector<2x1xf32>
    %312 = vector.extract_strided_slice %1 {offsets = [2, 0], sizes = [1, 16], strides = [1, 1]} : vector<4x16xf32> to vector<1x16xf32>
    %313 = vector.broadcast %311 : vector<2x1xf32> to vector<2x16xf32>
    %314 = vector.broadcast %312 : vector<1x16xf32> to vector<2x16xf32>
    %315 = arith.mulf %313, %314 : vector<2x16xf32>
    %316 = arith.addf %310, %315 : vector<2x16xf32>
    %317 = vector.extract_strided_slice %296 {offsets = [0, 3], sizes = [2, 1], strides = [1, 1]} : vector<2x4xf32> to vector<2x1xf32>
    %318 = vector.extract_strided_slice %1 {offsets = [3, 0], sizes = [1, 16], strides = [1, 1]} : vector<4x16xf32> to vector<1x16xf32>
    %319 = vector.broadcast %317 : vector<2x1xf32> to vector<2x16xf32>
    %320 = vector.broadcast %318 : vector<1x16xf32> to vector<2x16xf32>
    %321 = arith.mulf %319, %320 : vector<2x16xf32>
    %322 = arith.addf %316, %321 : vector<2x16xf32>
    %323 = arith.negf %322 : vector<2x16xf32>
    %324 = math.exp %323 : vector<2x16xf32>
    %cst_15 = arith.constant 1.000000e+00 : f32
    %325 = vector.broadcast %cst_15 : f32 to vector<2x16xf32>
    %326 = arith.addf %325, %324 : vector<2x16xf32>
    %327 = arith.divf %325, %326 : vector<2x16xf32>
    %328 = math.tanh %322 : vector<2x16xf32>
    %329 = vector.extract_strided_slice %327 {offsets = [0, 0], sizes = [2, 4], strides = [1, 1]} : vector<2x16xf32> to vector<2x4xf32>
    %330 = vector.extract_strided_slice %327 {offsets = [0, 4], sizes = [2, 4], strides = [1, 1]} : vector<2x16xf32> to vector<2x4xf32>
    %331 = vector.extract_strided_slice %328 {offsets = [0, 8], sizes = [2, 4], strides = [1, 1]} : vector<2x16xf32> to vector<2x4xf32>
    %332 = vector.extract_strided_slice %327 {offsets = [0, 12], sizes = [2, 4], strides = [1, 1]} : vector<2x16xf32> to vector<2x4xf32>
    %333 = arith.mulf %330, %294 : vector<2x4xf32>
    %334 = arith.mulf %329, %331 : vector<2x4xf32>
    %335 = arith.addf %333, %334 : vector<2x4xf32>
    %336 = math.tanh %335 : vector<2x4xf32>
    %337 = arith.mulf %332, %336 : vector<2x4xf32>
    %c0_16 = arith.constant 0 : index
    %c0_17 = arith.constant 0 : index
    %338 = vector.load %arg2[%c0_16, %c0_17] : memref<5x128xf32, #tpu.memory_space<vmem>>, vector<4x128xf32>
    %c4 = arith.constant 4 : index
    %c0_18 = arith.constant 0 : index
    %339 = vector.load %arg2[%c4, %c0_18] : memref<5x128xf32, #tpu.memory_space<vmem>>, vector<1x128xf32>
    %c0_19 = arith.constant 0 : index
    %c0_20 = arith.constant 0 : index
    %340 = vector.load %arg3[%c0_19, %c0_20] : memref<129x1xf32, #tpu.memory_space<vmem>>, vector<128x1xf32>
    %c128 = arith.constant 128 : index
    %c0_21 = arith.constant 0 : index
    %341 = vector.load %arg3[%c128, %c0_21] : memref<129x1xf32, #tpu.memory_space<vmem>>, vector<1x1xf32>
    %cst_22 = arith.constant 0.000000e+00 : f32
    %342 = vector.broadcast %cst_22 : f32 to vector<2x4xf32>
    %343 = arith.maximumf %337, %342 : vector<2x4xf32>
    %cst_23 = arith.constant dense<0.000000e+00> : vector<2x128xf32>
    %344 = tpu.matmul %343, %338, %cst_23 {dimension_numbers = #tpu.dot_dimension_numbers<[1], [0], [0], [1], [0, 0, 1, 1], [], []>} : vector<2x4xf32>, vector<4x128xf32>, vector<2x128xf32> -> vector<2x128xf32>
    %345 = vector.broadcast %339 : vector<1x128xf32> to vector<2x128xf32>
    %346 = arith.addf %344, %345 : vector<2x128xf32>
    %cst_24 = arith.constant 0.000000e+00 : f32
    %347 = vector.broadcast %cst_24 : f32 to vector<2x128xf32>
    %348 = arith.maximumf %346, %347 : vector<2x128xf32>
    %cst_25 = arith.constant dense<0.000000e+00> : vector<2x1xf32>
    %349 = tpu.matmul %348, %340, %cst_25 {dimension_numbers = #tpu.dot_dimension_numbers<[1], [0], [0], [1], [0, 0, 1, 1], [], []>} : vector<2x128xf32>, vector<128x1xf32>, vector<2x1xf32> -> vector<2x1xf32>
    %350 = vector.broadcast %341 : vector<1x1xf32> to vector<2x1xf32>
    %351 = arith.addf %349, %350 : vector<2x1xf32>
    %c0_26 = arith.constant 0 : index
    %c0_27 = arith.constant 0 : index
    %352 = vector.load %arg4[%c0_26, %c0_27] : memref<2x1xf32, #tpu.memory_space<vmem>>, vector<2x1xf32>
    tpu.vector_store %arg4[%c0_26, %c0_27], %351 {strides = array<i32>} : memref<2x1xf32, #tpu.memory_space<vmem>>, vector<2x1xf32>,
    return
  }
}

</mosaic_0001>

<bundles_post_ra>
// kernel: tpu_custom_call.1
= control target key start
LH: loop header
LB: loop body
LE: loop exit
PB: predicated region body
PF: predicated region fallthrough
CT: control target
= control target key end

     0   :  { %vm30_vm0 = vcmask 1040384   ;;  %vm23_vm1 = vcmask 7168   ;;  %s1529_s25 = smov 8   ;;  %s1534_s28 = smov 116   ;;  %s1884_s1 = inlined_call_operand.vmem [shape: f32[6,16], index: 1, kind: input, shape index: {}]   ;;  %s1885_s0 = inlined_call_operand.vmem [shape: f32[2,8,1], index: 0, kind: input, shape index: {}]   ;;  %s1886_s2 = inlined_call_operand.vmem [shape: f32[5,128], index: 2, kind: input, shape index: {}]   ;;  %s1887_s3 = inlined_call_operand.vmem [shape: f32[129,1], index: 3, kind: input, shape index: {}]   ;;  %s1888_s4 = inlined_call_operand.vmem [shape: f32[2,1], index: 4, kind: output, shape index: {}]  }
   0x1   :  { %v17_v0 = vld [vmem:[%s1884_s1] sm:$0x1]  ;;  %v21_v2 = vld [vmem:[%s1885_s0 + $0x8] sm:$0xff]  ;;  %v18_v3 = vld [vmem:[%s1884_s1 + $0x1] sm:$0xf] }
   0x2   :  { %v20_v1 = vld [vmem:[%s1885_s0] sm:$0xff]  ;;  %1310 = vmatpush.msk.msra.mxu0 %vm30_vm0, %v17_v0  ;;  %v1572_v4 = vperm.slane %v18_v3, 0  ;;  %v1574_v5 = vperm.slane %v18_v3, 1  ;;  %v1579_v7 = vperm.slane %v18_v3, 2  ;;  %v1582_v10 = vperm.slane %v18_v3, 3  ;;  %s1527_s0 = smov 120  }
   0x3   :  { %1311 = vmatmul.msk.f32.vlgmr.msra.gmra.mxu0 %vm23_vm1, %v20_v1  ;;  %v1396_v6 = vld [vmem:[%s1884_s1 + $0x5] ss:$0 sm:$0xff]  ;;  %s1528_s1 = smov 4   ;;  %v1530_v1 = vmov 13  }
   0x4   :  { %v58_v8 = vmul.f32 0.0, %v1572_v4  ;;  %v62_v12 = vmul.f32 0.0, %v1574_v5  ;;  %v66_v14 = vmul.f32 0.0, %v1579_v7  ;;  %v70_v16 = vmul.f32 0.0, %v1582_v10  ;;  %1340 = vset.pattern.permute.xlu2 %v1530_v1 }
   0xb   :  { %1312 = vmatmul.msk.f32.gmra.mxu0 %vm23_vm1, %v21_v2  ;;  %v1531_v2 = vmov 12  }
   0xc   :  { %1339 = vset.pattern.permute.xlu0 %v1531_v2  ;;  %1342 = vset.pattern.permute.xlu1 %v1531_v2 }
  0x80   :  { %v51_v9 = vpop.f32.mrf.mxu0 }
  0x81   :  { %v1584_v11 = vadd.f32 %v1396_v6, %v51_v9 }
  0x83   :  { %v59_v13 = vadd.f32 %v58_v8, %v1584_v11 }
  0x85   :  { %v63_v15 = vadd.f32 %v62_v12, %v59_v13  ;;  %v1533_v13 = vmov 15  }
  0x87   :  { %v67_v17 = vadd.f32 %v66_v14, %v63_v15 }
  0x88   :  { %v54_v18 = vpop.f32.mrf.mxu0 }
  0x89   :  { %v1590_v19 = vadd.f32 %v1396_v6, %v54_v18  ;;  %v71_v20 = vadd.f32 %v70_v16, %v67_v17 }
  0x8b   :  { %v60_v21 = vadd.f32 %v58_v8, %v1590_v19  ;;  %1399 = vtanh.f32 %v71_v20  ;;  %v1313_v27 = vmul.f32 -1.442695, %v71_v20 }
  0x8d   :  { %v64_v22 = vadd.f32 %v62_v12, %v60_v21  ;;  %v1532_v12 = vmov 14  }
  0x8f   :  { %v68_v23 = vadd.f32 %v66_v14, %v64_v22 }
  0x91   :  { %v1400_v24 = vpop.eup %1399  ;;  %v72_v25 = vadd.f32 %v70_v16, %v68_v23 }
  0x92   :  { %117 = vrot.lane.b32.xlu0 %v1400_v24, %s1527_s0 }
  0x93   :  { %1401 = vtanh.f32 %v72_v25  ;;  %v1314_v28 = vmul.f32 -1.442695, %v72_v25 }
  0x94   :  { %1403 = vpow2.f32 %v1313_v27 }
  0x95   :  { %1405 = vpow2.f32 %v1314_v28 }
  0x99   :  { %v1402_v26 = vpop.eup %1401 }
  0x9a   :  { %119 = vrot.lane.b32.xlu0 %v1402_v26, %s1527_s0  ;;  %v1404_v29 = vpop.eup %1403 }
  0x9b   :  { %v79_v30 = vadd.f32 1.0, %v1404_v29  ;;  %v1406_v31 = vpop.eup %1405 }
  0x9c   :  { %v80_v32 = vadd.f32 1.0, %v1406_v31 }
  0x9d   :  { %1407 = vrcp.f32 %v79_v30  ;;  %v92_v41 = vand.u32 2147483648, %v79_v30  ;;  %vm86_vm3 = vweird.f32 %v79_v30  ;;  %v90_v42 = vand.u32 2147483647, %v79_v30 }
  0x9e   :  { %1409 = vrcp.f32 %v80_v32  ;;  %v107_v50 = vand.u32 2147483648, %v80_v32  ;;  %vm101_vm7 = vweird.f32 %v80_v32  ;;  %v105_v51 = vand.u32 2147483647, %v80_v32 }
  0x9f   :  { %v93_v45 = vor.u32 1.1754944e-38, %v92_v41  ;;  %vm91_vm5 = vcmp.eq.f32.partialorder %v90_v42, 8.507059e+37 }
  0xa0   :  { %v108_v53 = vor.u32 1.1754944e-38, %v107_v50  ;;  %vm106_vm9 = vcmp.eq.f32.partialorder %v105_v51, 8.507059e+37 }
  0xa3   :  { %v1408_v33 = vpop.eup %1407 }
  0xa4   :  { %v82_v34 = vmul.f32 %v1408_v33, %v79_v30  ;;  %v1410_v36 = vpop.eup %1409  ;;  %vm87_vm2 = vweird.f32 %v1408_v33 }
  0xa5   :  { %v97_v38 = vmul.f32 %v1410_v36, %v80_v32  ;;  %vm88_vm4 = vmor %vm86_vm3, %vm87_vm2  ;;  %vm102_vm6 = vweird.f32 %v1410_v36 }
  0xa6   :  { %v83_v35 = vsub.f32 1.0, %v82_v34  ;;  %vm103_vm8 = vmor %vm101_vm7, %vm102_vm6 }
  0xa7   :  { %v98_v40 = vsub.f32 1.0, %v97_v38 }
  0xa8   :  { %v84_v37 = vmul.f32 %v1408_v33, %v83_v35 }
  0xa9   :  { %v99_v44 = vmul.f32 %v1410_v36, %v98_v40 }
  0xaa   :  { %v85_v39 = vadd.f32 %v1408_v33, %v84_v37 }
  0xab   :  { %v100_v49 = vadd.f32 %v1410_v36, %v99_v44 }
  0xac   :  { %v89_v43 = vsel %vm88_vm4, %v1408_v33, %v85_v39 }
  0xad   :  { %v94_v47 = vsel %vm91_vm5, %v93_v45, %v89_v43  ;;  %v104_v52 = vsel %vm103_vm8, %v1410_v36, %v100_v49 }
  0xae   :  { %v109_v54 = vsel %vm106_vm9, %v108_v53, %v104_v52  ;;  %v113_v57 = vmul.f32 0.0, %v94_v47 }
  0xaf   :  { %v114_v60 = vmul.f32 0.0, %v109_v54 }
 0x104   :  { %v118_v46 = vpop.permute.xlu0 %117 }
 0x105   :  { %v123_v48 = vmul.f32 %v118_v46, %v94_v47 }
 0x107   :  { %127 = vrot.lane.b32.xlu1 %v123_v48, %s1528_s1 }
 0x10c   :  { %v120_v55 = vpop.permute.xlu0 %119 }
 0x10d   :  { %v124_v56 = vmul.f32 %v120_v55, %v109_v54 }
 0x10f   :  { %129 = vrot.lane.b32.xlu1 %v124_v56, %s1528_s1 }
 0x179   :  { %v128_v58 = vpop.permute.xlu1 %127 }
 0x17a   :  { %v1597_v59 = vadd.f32 %v128_v58, %v113_v57 }
 0x17c   :  { %1411 = vtanh.f32 %v1597_v59 }
 0x181   :  { %v130_v61 = vpop.permute.xlu1 %129 }
 0x182   :  { %v1412_v62 = vpop.eup %1411  ;;  %v1600_v63 = vadd.f32 %v130_v61, %v114_v60 }
 0x183   :  { %139 = vrot.lane.b32.xlu2 %v1412_v62, %s1529_s25 }
 0x184   :  { %1413 = vtanh.f32 %v1600_v63 }
 0x18a   :  { %v1414_v0 = vpop.eup %1413 }
 0x18b   :  { %141 = vrot.lane.b32.xlu2 %v1414_v0, %s1529_s25 }
 0x1dd   :  { %v140_v3 = vpop.permute.xlu2 %139 }
 0x1de   :  { %v145_v6 = vmul.f32 %v140_v3, %v94_v47 }
 0x1e0   :  { %168 = vperm.xlu2 %1340, %v145_v6   ;;  %149 = vperm.xlu0 %1339, %v145_v6  }
 0x1e5   :  { %v142_v8 = vpop.permute.xlu2 %141 }
 0x1e6   :  { %v146_v9 = vmul.f32 %v142_v8, %v109_v54 }
 0x1e8   :  { %1341 = vset.pattern.permute.xlu2 %v1532_v12  ;;  %1344 = vset.pattern.permute.xlu0 %v1532_v12 }
 0x1e9   :  { %154 = vperm.xlu1 %1342, %v146_v9   ;;  %186 = vperm.xlu2 %1341, %v145_v6  }
 0x1ea   :  { %190 = vperm.xlu0 %1344, %v146_v9  }
 0x1f1   :  { %1343 = vset.pattern.permute.xlu1 %v1530_v1  ;;  %1346 = vset.pattern.permute.xlu2 %v1533_v13 }
 0x1f2   :  { %172 = vperm.xlu1 %1343, %v146_v9   ;;  %208 = vperm.xlu2 %1346, %v146_v9  }
 0x1f3   :  { %1348 = vset.pattern.permute.xlu0 %v1530_v1 }
 0x1fa   :  { %1345 = vset.pattern.permute.xlu1 %v1533_v13  ;;  %1349 = vset.pattern.permute.xlu2 %v1532_v12 }
 0x1fb   :  { %204 = vperm.xlu1 %1345, %v145_v6  }
 0x203   :  { %1347 = vset.pattern.permute.xlu1 %v1531_v2 }
 0x23a   :  { %v169_v14 = vpop.permute.xlu2 %168 }
 0x23b   :  { %v175_v28 = vmul.f32 %v169_v14, %v1574_v5 }
 0x23d   :  { %v179_v35 = vrot.slane %v175_v28, 7 }
 0x243   :  { %v187_v16 = vpop.permute.xlu2 %186 }
 0x244   :  { %v193_v36 = vmul.f32 %v187_v16, %v1579_v7 }
 0x246   :  { %v197_v42 = vrot.slane %v193_v36, 7 }
 0x24c   :  { %v209_v23 = vpop.permute.xlu2 %208 }
 0x24d   :  { %v212_v29 = vmul.f32 %v209_v23, %v1582_v10 }
 0x24f   :  { %v216_v37 = vrot.slane %v212_v29, 7 }
 0x252   :  { %v150_v15 = vpop.permute.xlu0 %149 }
 0x253   :  { %v157_v20 = vmul.f32 %v150_v15, %v1572_v4 }
 0x255   :  { %v161_v24 = vrot.slane %v157_v20, 7 }
 0x257   :  { %v165_v32 = vadd.f32 %v161_v24, %v1584_v11 }
 0x259   :  { %v183_v39 = vadd.f32 %v179_v35, %v165_v32  ;;  %v263_v32 = vrot.slane %v1597_v59, 7 }
 0x25b   :  { %v155_v17 = vpop.permute.xlu1 %154  ;;  %v201_v44 = vadd.f32 %v197_v42, %v183_v39 }
 0x25c   :  { %v158_v18 = vmul.f32 %v155_v17, %v1572_v4  ;;  %v191_v21 = vpop.permute.xlu0 %190 }
 0x25d   :  { %v194_v26 = vmul.f32 %v191_v21, %v1579_v7 }
 0x25e   :  { %v162_v22 = vrot.slane %v158_v18, 7 }
 0x25f   :  { %v198_v33 = vrot.slane %v194_v26, 7 }
 0x260   :  { %v166_v30 = vadd.f32 %v162_v22, %v1590_v19 }
 0x264   :  { %v173_v25 = vpop.permute.xlu1 %172 }
 0x265   :  { %v176_v27 = vmul.f32 %v173_v25, %v1574_v5 }
 0x267   :  { %v180_v31 = vrot.slane %v176_v27, 7  ;;  %v264_v27 = vrot.slane %v1600_v63, 7 }
 0x269   :  { %v184_v34 = vadd.f32 %v180_v31, %v166_v30 }
 0x26b   :  { %v202_v38 = vadd.f32 %v198_v33, %v184_v34 }
 0x26d   :  { %v220_v40 = vadd.f32 %v216_v37, %v202_v38  ;;  %v205_v41 = vpop.permute.xlu1 %204 }
 0x26e   :  { %v211_v43 = vmul.f32 %v205_v41, %v1582_v10 }
 0x26f   :  { %1415 = vtanh.f32 %v220_v40  ;;  %v1316_v49 = vmul.f32 -1.442695, %v220_v40 }
 0x270   :  { %v215_v45 = vrot.slane %v211_v43, 7 }
 0x272   :  { %v219_v46 = vadd.f32 %v215_v45, %v201_v44 }
 0x274   :  { %1417 = vtanh.f32 %v219_v46  ;;  %v1315_v54 = vmul.f32 -1.442695, %v219_v46 }
 0x275   :  { %v1416_v47 = vpop.eup %1415  ;;  %1419 = vpow2.f32 %v1316_v49 }
 0x276   :  { %273 = vrot.lane.b32.xlu2 %v1416_v47, %s1527_s0 }
 0x27a   :  { %v1418_v48 = vpop.eup %1417 }
 0x27b   :  { %271 = vrot.lane.b32.xlu1 %v1418_v48, %s1527_s0  ;;  %v1420_v50 = vpop.eup %1419 }
 0x27c   :  { %v228_v51 = vadd.f32 1.0, %v1420_v50 }
 0x27e   :  { %1421 = vrcp.f32 %v228_v51  ;;  %v255_v60 = vand.u32 2147483648, %v228_v51  ;;  %vm249_vm11 = vweird.f32 %v228_v51  ;;  %v253_v61 = vand.u32 2147483647, %v228_v51 }
 0x27f   :  { %1423 = vpow2.f32 %v1315_v54 }
 0x280   :  { %v256_v3 = vor.u32 1.1754944e-38, %v255_v60  ;;  %vm254_vm13 = vcmp.eq.f32.partialorder %v253_v61, 8.507059e+37 }
 0x284   :  { %v1422_v52 = vpop.eup %1421 }
 0x285   :  { %v245_v53 = vmul.f32 %v1422_v52, %v228_v51  ;;  %vm250_vm10 = vweird.f32 %v1422_v52  ;;  %v1424_v58 = vpop.eup %1423 }
 0x286   :  { %vm251_vm12 = vmor %vm249_vm11, %vm250_vm10  ;;  %v227_v62 = vadd.f32 1.0, %v1424_v58 }
 0x287   :  { %v246_v55 = vsub.f32 1.0, %v245_v53 }
 0x288   :  { %1425 = vrcp.f32 %v227_v62  ;;  %v240_v20 = vand.u32 2147483648, %v227_v62  ;;  %vm234_vm15 = vweird.f32 %v227_v62  ;;  %v238_v21 = vand.u32 2147483647, %v227_v62 }
 0x289   :  { %v247_v56 = vmul.f32 %v1422_v52, %v246_v55 }
 0x28a   :  { %v241_v23 = vor.u32 1.1754944e-38, %v240_v20  ;;  %vm239_vm1 = vcmp.eq.f32.partialorder %v238_v21, 8.507059e+37 }
 0x28b   :  { %v248_v57 = vadd.f32 %v1422_v52, %v247_v56 }
 0x28d   :  { %v252_v0 = vsel %vm251_vm12, %v1422_v52, %v248_v57 }
 0x28e   :  { %v257_v8 = vsel %vm254_vm13, %v256_v3, %v252_v0  ;;  %v1426_v14 = vpop.eup %1425 }
 0x28f   :  { %v230_v15 = vmul.f32 %v1426_v14, %v227_v62  ;;  %vm235_vm14 = vweird.f32 %v1426_v14  ;;  %v268_v28 = vmul.f32 %v264_v27, %v257_v8 }
 0x290   :  { %vm236_vm0 = vmor %vm234_vm15, %vm235_vm14 }
 0x291   :  { %v231_v16 = vsub.f32 1.0, %v230_v15 }
 0x293   :  { %v232_v17 = vmul.f32 %v1426_v14, %v231_v16 }
 0x295   :  { %v233_v18 = vadd.f32 %v1426_v14, %v232_v17 }
 0x297   :  { %v237_v22 = vsel %vm236_vm0, %v1426_v14, %v233_v18 }
 0x298   :  { %v242_v25 = vsel %vm239_vm1, %v241_v23, %v237_v22 }
 0x299   :  { %v267_v33 = vmul.f32 %v263_v32, %v242_v25 }
 0x2d0   :  { %v274_v6 = vpop.permute.xlu2 %273 }
 0x2d1   :  { %v278_v9 = vmul.f32 %v274_v6, %v257_v8 }
 0x2d3   :  { %283 = vrot.lane.b32.xlu1 %v278_v9, %s1528_s1 }
 0x2ed   :  { %v272_v24 = vpop.permute.xlu1 %271 }
 0x2ee   :  { %v277_v26 = vmul.f32 %v272_v24, %v242_v25 }
 0x2f0   :  { %281 = vrot.lane.b32.xlu0 %v277_v26, %s1528_s1 }
 0x345   :  { %v284_v29 = vpop.permute.xlu1 %283 }
 0x346   :  { %v1631_v30 = vadd.f32 %v284_v29, %v268_v28 }
 0x348   :  { %1427 = vtanh.f32 %v1631_v30 }
 0x34e   :  { %v1428_v31 = vpop.eup %1427 }
 0x34f   :  { %295 = vrot.lane.b32.xlu0 %v1428_v31, %s1529_s25 }
 0x362   :  { %v282_v34 = vpop.permute.xlu0 %281 }
 0x363   :  { %v1636_v35 = vadd.f32 %v282_v34, %v267_v33 }
 0x365   :  { %1429 = vtanh.f32 %v1636_v35 }
 0x36b   :  { %v1430_v36 = vpop.eup %1429 }
 0x36c   :  { %293 = vrot.lane.b32.xlu2 %v1430_v36, %s1529_s25 }
 0x3c1   :  { %v296_v38 = vpop.permute.xlu0 %295 }
 0x3c2   :  { %v300_v39 = vmul.f32 %v296_v38, %v257_v8 }
 0x3c6   :  { %v294_v63 = vpop.permute.xlu2 %293 }
 0x3c7   :  { %v299_v37 = vmul.f32 %v294_v63, %v242_v25 }
 0x3c9   :  { %340 = vperm.xlu2 %1349, %v299_v37   ;;  %303 = vperm.xlu1 %1347, %v299_v37  }
 0x3ca   :  { %322 = vperm.xlu0 %1348, %v299_v37  }
 0x3d1   :  { %1350 = vset.pattern.permute.xlu2 %v1531_v2  ;;  %1351 = vset.pattern.permute.xlu1 %v1530_v1 }
 0x3d2   :  { %1354 = vset.pattern.permute.xlu0 %v1533_v13  ;;  %326 = vperm.xlu1 %1351, %v300_v39  }
 0x3d3   :  { %362 = vperm.xlu0 %1354, %v300_v39   ;;  %308 = vperm.xlu2 %1350, %v300_v39  }
 0x3da   :  { %1352 = vset.pattern.permute.xlu1 %v1532_v12 }
 0x3db   :  { %1353 = vset.pattern.permute.xlu2 %v1533_v13  ;;  %344 = vperm.xlu1 %1352, %v300_v39  }
 0x3dc   :  { %358 = vperm.xlu2 %1353, %v299_v37   ;;  %1358 = vset.pattern.permute.xlu0 %v1531_v2 }
 0x3e3   :  { %1356 = vset.pattern.permute.xlu1 %v1530_v1 }
 0x3e4   :  { %1355 = vset.pattern.permute.xlu2 %v1531_v2 }
 0x423   :  { %v341_v59 = vpop.permute.xlu2 %340 }
 0x424   :  { %v347_v46 = vmul.f32 %v341_v59, %v1579_v7 }
 0x426   :  { %v351_v51 = vrot.slane %v347_v46, 7 }
 0x42d   :  { %v309_v40 = vpop.permute.xlu2 %308 }
 0x42e   :  { %v312_v56 = vmul.f32 %v309_v40, %v1572_v4 }
 0x430   :  { %v316_v60 = vrot.slane %v312_v56, 7  ;;  %v417_v56 = vrot.slane %v1636_v35, 7 }
 0x432   :  { %v320_v6 = vadd.f32 %v316_v60, %v1590_v19 }
 0x436   :  { %v359_v44 = vpop.permute.xlu2 %358 }
 0x437   :  { %v365_v48 = vmul.f32 %v359_v44, %v1582_v10 }
 0x439   :  { %v369_v53 = vrot.slane %v365_v48, 7 }
 0x43b   :  { %v304_v41 = vpop.permute.xlu1 %303 }
 0x43c   :  { %v311_v42 = vmul.f32 %v304_v41, %v1572_v4  ;;  %v323_v43 = vpop.permute.xlu0 %322 }
 0x43d   :  { %v329_v45 = vmul.f32 %v323_v43, %v1574_v5 }
 0x43e   :  { %v315_v47 = vrot.slane %v311_v42, 7 }
 0x43f   :  { %v333_v50 = vrot.slane %v329_v45, 7 }
 0x440   :  { %v319_v49 = vadd.f32 %v315_v47, %v1584_v11 }
 0x442   :  { %v337_v52 = vadd.f32 %v333_v50, %v319_v49 }
 0x444   :  { %v355_v54 = vadd.f32 %v351_v51, %v337_v52  ;;  %v327_v55 = vpop.permute.xlu1 %326  ;;  %v418_v51 = vrot.slane %v1631_v30, 7 }
 0x445   :  { %v330_v58 = vmul.f32 %v327_v55, %v1574_v5  ;;  %v363_v61 = vpop.permute.xlu0 %362 }
 0x446   :  { %v373_v57 = vadd.f32 %v369_v53, %v355_v54  ;;  %v366_v8 = vmul.f32 %v363_v61, %v1582_v10 }
 0x447   :  { %v334_v62 = vrot.slane %v330_v58, 7 }
 0x448   :  { %1431 = vtanh.f32 %v373_v57  ;;  %v370_v16 = vrot.slane %v366_v8, 7  ;;  %v1317_v23 = vmul.f32 -1.442695, %v373_v57 }
 0x449   :  { %v338_v14 = vadd.f32 %v334_v62, %v320_v6 }
 0x44d   :  { %v345_v0 = vpop.permute.xlu1 %344 }
 0x44e   :  { %v1432_v3 = vpop.eup %1431  ;;  %v348_v9 = vmul.f32 %v345_v0, %v1579_v7 }
 0x44f   :  { %425 = vrot.lane.b32.xlu1 %v1432_v3, %s1527_s0 }
 0x450   :  { %v352_v15 = vrot.slane %v348_v9, 7 }
 0x452   :  { %v356_v17 = vadd.f32 %v352_v15, %v338_v14 }
 0x454   :  { %v374_v18 = vadd.f32 %v370_v16, %v356_v17 }
 0x456   :  { %1433 = vtanh.f32 %v374_v18  ;;  %v1318_v21 = vmul.f32 -1.442695, %v374_v18 }
 0x458   :  { %1435 = vpow2.f32 %v1318_v21 }
 0x459   :  { %1437 = vpow2.f32 %v1317_v23 }
 0x45c   :  { %v1434_v20 = vpop.eup %1433 }
 0x45d   :  { %427 = vrot.lane.b32.xlu2 %v1434_v20, %s1527_s0 }
 0x45e   :  { %v1436_v22 = vpop.eup %1435 }
 0x45f   :  { %v382_v24 = vadd.f32 1.0, %v1436_v22  ;;  %v1438_v25 = vpop.eup %1437 }
 0x460   :  { %v381_v27 = vadd.f32 1.0, %v1438_v25 }
 0x461   :  { %1439 = vrcp.f32 %v382_v24  ;;  %v409_v36 = vand.u32 2147483648, %v382_v24  ;;  %vm403_vm3 = vweird.f32 %v382_v24  ;;  %v407_v63 = vand.u32 2147483647, %v382_v24 }
 0x462   :  { %1441 = vrcp.f32 %v381_v27  ;;  %v394_v44 = vand.u32 2147483648, %v381_v27  ;;  %vm388_vm7 = vweird.f32 %v381_v27  ;;  %v392_v45 = vand.u32 2147483647, %v381_v27 }
 0x463   :  { %v410_v39 = vor.u32 1.1754944e-38, %v409_v36  ;;  %vm408_vm5 = vcmp.eq.f32.partialorder %v407_v63, 8.507059e+37 }
 0x464   :  { %v395_v47 = vor.u32 1.1754944e-38, %v394_v44  ;;  %vm393_vm9 = vcmp.eq.f32.partialorder %v392_v45, 8.507059e+37 }
 0x467   :  { %v1440_v26 = vpop.eup %1439 }
 0x468   :  { %v399_v28 = vmul.f32 %v1440_v26, %v382_v24  ;;  %v1442_v31 = vpop.eup %1441  ;;  %vm404_vm2 = vweird.f32 %v1440_v26 }
 0x469   :  { %v384_v33 = vmul.f32 %v1442_v31, %v381_v27  ;;  %vm405_vm4 = vmor %vm403_vm3, %vm404_vm2  ;;  %vm389_vm6 = vweird.f32 %v1442_v31 }
 0x46a   :  { %v400_v29 = vsub.f32 1.0, %v399_v28  ;;  %vm390_vm8 = vmor %vm388_vm7, %vm389_vm6 }
 0x46b   :  { %v385_v37 = vsub.f32 1.0, %v384_v33 }
 0x46c   :  { %v401_v32 = vmul.f32 %v1440_v26, %v400_v29 }
 0x46d   :  { %v386_v59 = vmul.f32 %v1442_v31, %v385_v37 }
 0x46e   :  { %v402_v34 = vadd.f32 %v1440_v26, %v401_v32 }
 0x46f   :  { %v387_v43 = vadd.f32 %v1442_v31, %v386_v59 }
 0x470   :  { %v406_v38 = vsel %vm405_vm4, %v1440_v26, %v402_v34 }
 0x471   :  { %v411_v41 = vsel %vm408_vm5, %v410_v39, %v406_v38  ;;  %v391_v46 = vsel %vm390_vm8, %v1442_v31, %v387_v43 }
 0x472   :  { %v396_v49 = vsel %vm393_vm9, %v395_v47, %v391_v46  ;;  %v422_v52 = vmul.f32 %v418_v51, %v411_v41 }
 0x473   :  { %v421_v57 = vmul.f32 %v417_v56, %v396_v49 }
 0x4b7   :  { %v428_v40 = vpop.permute.xlu2 %427 }
 0x4b8   :  { %v432_v42 = vmul.f32 %v428_v40, %v411_v41 }
 0x4ba   :  { %437 = vrot.lane.b32.xlu2 %v432_v42, %s1528_s1 }
 0x4c1   :  { %v426_v48 = vpop.permute.xlu1 %425 }
 0x4c2   :  { %v431_v50 = vmul.f32 %v426_v48, %v396_v49 }
 0x4c4   :  { %435 = vrot.lane.b32.xlu1 %v431_v50, %s1528_s1 }
 0x514   :  { %v438_v53 = vpop.permute.xlu2 %437 }
 0x515   :  { %v1663_v54 = vadd.f32 %v438_v53, %v422_v52 }
 0x517   :  { %1443 = vtanh.f32 %v1663_v54 }
 0x51d   :  { %v1444_v55 = vpop.eup %1443 }
 0x51e   :  { %449 = vrot.lane.b32.xlu1 %v1444_v55, %s1529_s25 }
 0x536   :  { %v436_v58 = vpop.permute.xlu1 %435 }
 0x537   :  { %v1668_v60 = vadd.f32 %v436_v58, %v421_v57 }
 0x539   :  { %1445 = vtanh.f32 %v1668_v60 }
 0x53f   :  { %v1446_v61 = vpop.eup %1445 }
 0x540   :  { %447 = vrot.lane.b32.xlu0 %v1446_v61, %s1529_s25 }
 0x590   :  { %v450_v30 = vpop.permute.xlu1 %449 }
 0x591   :  { %v454_v62 = vmul.f32 %v450_v30, %v411_v41 }
 0x593   :  { %462 = vperm.xlu0 %1358, %v454_v62  }
 0x59b   :  { %1361 = vset.pattern.permute.xlu0 %v1533_v13 }
 0x5b2   :  { %v448_v0 = vpop.permute.xlu0 %447 }
 0x5b3   :  { %v453_v3 = vmul.f32 %v448_v0, %v396_v49 }
 0x5b5   :  { %512 = vperm.xlu0 %1361, %v453_v3   ;;  %476 = vperm.xlu1 %1356, %v453_v3  }
 0x5b6   :  { %457 = vperm.xlu2 %1355, %v453_v3  }
 0x5bd   :  { %1357 = vset.pattern.permute.xlu1 %v1532_v12  ;;  %1363 = vset.pattern.permute.xlu0 %v1531_v2 }
 0x5be   :  { %1359 = vset.pattern.permute.xlu2 %v1530_v1  ;;  %494 = vperm.xlu1 %1357, %v453_v3  }
 0x5bf   :  { %480 = vperm.xlu2 %1359, %v454_v62  }
 0x5c6   :  { %1362 = vset.pattern.permute.xlu1 %v1533_v13 }
 0x5c7   :  { %1360 = vset.pattern.permute.xlu2 %v1532_v12  ;;  %516 = vperm.xlu1 %1362, %v454_v62  }
 0x5c8   :  { %498 = vperm.xlu2 %1360, %v454_v62  }
 0x5cf   :  { %1366 = vset.pattern.permute.xlu1 %v1531_v2 }
 0x5d0   :  { %1364 = vset.pattern.permute.xlu2 %v1530_v1 }
 0x605   :  { %v463_v6 = vpop.permute.xlu0 %462 }
 0x606   :  { %v466_v20 = vmul.f32 %v463_v6, %v1572_v4 }
 0x608   :  { %v470_v29 = vrot.slane %v466_v20, 7 }
 0x60a   :  { %v474_v63 = vadd.f32 %v470_v29, %v1590_v19 }
 0x610   :  { %v458_v35 = vpop.permute.xlu2 %457 }
 0x611   :  { %v465_v14 = vmul.f32 %v458_v35, %v1572_v4 }
 0x613   :  { %v469_v16 = vrot.slane %v465_v14, 7 }
 0x615   :  { %v473_v22 = vadd.f32 %v469_v16, %v1584_v11 }
 0x619   :  { %v481_v8 = vpop.permute.xlu2 %480 }
 0x61a   :  { %v484_v26 = vmul.f32 %v481_v8, %v1574_v5 }
 0x61c   :  { %v488_v34 = vrot.slane %v484_v26, 7 }
 0x61e   :  { %v492_v39 = vadd.f32 %v488_v34, %v474_v63 }
 0x622   :  { %v499_v23 = vpop.permute.xlu2 %498 }
 0x623   :  { %v502_v31 = vmul.f32 %v499_v23, %v1579_v7  ;;  %v571_v23 = vrot.slane %v1668_v60, 7 }
 0x625   :  { %v506_v37 = vrot.slane %v502_v31, 7 }
 0x627   :  { %v477_v9 = vpop.permute.xlu1 %476  ;;  %v513_v17 = vpop.permute.xlu0 %512  ;;  %v510_v40 = vadd.f32 %v506_v37, %v492_v39 }
 0x628   :  { %v483_v15 = vmul.f32 %v477_v9, %v1574_v5  ;;  %v519_v24 = vmul.f32 %v513_v17, %v1582_v10 }
 0x62a   :  { %v487_v18 = vrot.slane %v483_v15, 7  ;;  %v523_v32 = vrot.slane %v519_v24, 7 }
 0x62c   :  { %v491_v27 = vadd.f32 %v487_v18, %v473_v22 }
 0x630   :  { %v495_v21 = vpop.permute.xlu1 %494 }
 0x631   :  { %v501_v25 = vmul.f32 %v495_v21, %v1579_v7 }
 0x633   :  { %v505_v28 = vrot.slane %v501_v25, 7 }
 0x635   :  { %v509_v33 = vadd.f32 %v505_v28, %v491_v27  ;;  %v572_v28 = vrot.slane %v1663_v54, 7 }
 0x637   :  { %v527_v36 = vadd.f32 %v523_v32, %v509_v33 }
 0x639   :  { %1447 = vtanh.f32 %v527_v36  ;;  %v517_v38 = vpop.permute.xlu1 %516  ;;  %v1319_v45 = vmul.f32 -1.442695, %v527_v36 }
 0x63a   :  { %v520_v59 = vmul.f32 %v517_v38, %v1582_v10 }
 0x63c   :  { %v524_v41 = vrot.slane %v520_v59, 7 }
 0x63e   :  { %v528_v42 = vadd.f32 %v524_v41, %v510_v40 }
 0x63f   :  { %v1448_v43 = vpop.eup %1447 }
 0x640   :  { %1449 = vtanh.f32 %v528_v42  ;;  %579 = vrot.lane.b32.xlu2 %v1448_v43, %s1527_s0  ;;  %v1320_v51 = vmul.f32 -1.442695, %v528_v42 }
 0x641   :  { %1451 = vpow2.f32 %v1319_v45 }
 0x646   :  { %v1450_v44 = vpop.eup %1449 }
 0x647   :  { %581 = vrot.lane.b32.xlu1 %v1450_v44, %s1527_s0  ;;  %v1452_v46 = vpop.eup %1451 }
 0x648   :  { %v535_v47 = vadd.f32 1.0, %v1452_v46 }
 0x64a   :  { %1453 = vrcp.f32 %v535_v47  ;;  %v548_v55 = vand.u32 2147483648, %v535_v47  ;;  %vm542_vm11 = vweird.f32 %v535_v47  ;;  %v546_v56 = vand.u32 2147483647, %v535_v47 }
 0x64b   :  { %1455 = vpow2.f32 %v1320_v51 }
 0x64c   :  { %v549_v61 = vor.u32 1.1754944e-38, %v548_v55  ;;  %vm547_vm13 = vcmp.eq.f32.partialorder %v546_v56, 8.507059e+37 }
 0x650   :  { %v1454_v48 = vpop.eup %1453 }
 0x651   :  { %v538_v49 = vmul.f32 %v1454_v48, %v535_v47  ;;  %vm543_vm10 = vweird.f32 %v1454_v48  ;;  %v1456_v57 = vpop.eup %1455 }
 0x652   :  { %vm544_vm12 = vmor %vm542_vm11, %vm543_vm10  ;;  %v536_v30 = vadd.f32 1.0, %v1456_v57 }
 0x653   :  { %v539_v50 = vsub.f32 1.0, %v538_v49 }
 0x654   :  { %1457 = vrcp.f32 %v536_v30  ;;  %v563_v15 = vand.u32 2147483648, %v536_v30  ;;  %vm557_vm15 = vweird.f32 %v536_v30  ;;  %v561_v16 = vand.u32 2147483647, %v536_v30 }
 0x655   :  { %v540_v52 = vmul.f32 %v1454_v48, %v539_v50 }
 0x656   :  { %v564_v18 = vor.u32 1.1754944e-38, %v563_v15  ;;  %vm562_vm1 = vcmp.eq.f32.partialorder %v561_v16, 8.507059e+37 }
 0x657   :  { %v541_v53 = vadd.f32 %v1454_v48, %v540_v52 }
 0x659   :  { %v545_v58 = vsel %vm544_vm12, %v1454_v48, %v541_v53 }
 0x65a   :  { %v550_v0 = vsel %vm547_vm13, %v549_v61, %v545_v58  ;;  %v1458_v35 = vpop.eup %1457 }
 0x65b   :  { %v553_v6 = vmul.f32 %v1458_v35, %v536_v30  ;;  %vm558_vm14 = vweird.f32 %v1458_v35  ;;  %v575_v24 = vmul.f32 %v571_v23, %v550_v0 }
 0x65c   :  { %vm559_vm0 = vmor %vm557_vm15, %vm558_vm14 }
 0x65d   :  { %v554_v8 = vsub.f32 1.0, %v553_v6 }
 0x65f   :  { %v555_v9 = vmul.f32 %v1458_v35, %v554_v8 }
 0x661   :  { %v556_v14 = vadd.f32 %v1458_v35, %v555_v9 }
 0x663   :  { %v560_v17 = vsel %vm559_vm0, %v1458_v35, %v556_v14 }
 0x664   :  { %v565_v21 = vsel %vm562_vm1, %v564_v18, %v560_v17 }
 0x665   :  { %v576_v29 = vmul.f32 %v572_v28, %v565_v21 }
 0x69a   :  { %v580_v62 = vpop.permute.xlu2 %579 }
 0x69b   :  { %v585_v3 = vmul.f32 %v580_v62, %v550_v0 }
 0x69d   :  { %589 = vrot.lane.b32.xlu2 %v585_v3, %s1528_s1 }
 0x6b9   :  { %v582_v20 = vpop.permute.xlu1 %581 }
 0x6ba   :  { %v586_v22 = vmul.f32 %v582_v20, %v565_v21 }
 0x6bc   :  { %591 = vrot.lane.b32.xlu0 %v586_v22, %s1528_s1 }
 0x6f7   :  { %v590_v25 = vpop.permute.xlu2 %589 }
 0x6f8   :  { %v1695_v26 = vadd.f32 %v590_v25, %v575_v24 }
 0x6fa   :  { %1459 = vtanh.f32 %v1695_v26 }
 0x700   :  { %v1460_v27 = vpop.eup %1459 }
 0x701   :  { %601 = vrot.lane.b32.xlu1 %v1460_v27, %s1529_s25 }
 0x72e   :  { %v592_v31 = vpop.permute.xlu0 %591 }
 0x72f   :  { %v1700_v32 = vadd.f32 %v592_v31, %v576_v29 }
 0x731   :  { %1461 = vtanh.f32 %v1700_v32 }
 0x737   :  { %v1462_v33 = vpop.eup %1461 }
 0x738   :  { %603 = vrot.lane.b32.xlu2 %v1462_v33, %s1529_s25 }
 0x773   :  { %v602_v60 = vpop.permute.xlu1 %601 }
 0x774   :  { %v607_v34 = vmul.f32 %v602_v60, %v550_v0 }
 0x776   :  { %611 = vperm.xlu0 %1363, %v607_v34   ;;  %630 = vperm.xlu2 %1364, %v607_v34  }
 0x77e   :  { %1365 = vset.pattern.permute.xlu2 %v1532_v12  ;;  %1368 = vset.pattern.permute.xlu0 %v1532_v12 }
 0x77f   :  { %648 = vperm.xlu2 %1365, %v607_v34  }
 0x787   :  { %1370 = vset.pattern.permute.xlu2 %v1533_v13 }
 0x792   :  { %v604_v54 = vpop.permute.xlu2 %603 }
 0x793   :  { %v608_v36 = vmul.f32 %v604_v54, %v565_v21 }
 0x795   :  { %670 = vperm.xlu2 %1370, %v608_v36   ;;  %652 = vperm.xlu0 %1368, %v608_v36  }
 0x796   :  { %616 = vperm.xlu1 %1366, %v608_v36  }
 0x79d   :  { %1373 = vset.pattern.permute.xlu2 %v1532_v12  ;;  %1372 = vset.pattern.permute.xlu0 %v1530_v1 }
 0x79e   :  { %1367 = vset.pattern.permute.xlu1 %v1530_v1 }
 0x79f   :  { %634 = vperm.xlu1 %1367, %v608_v36  }
 0x7a7   :  { %1369 = vset.pattern.permute.xlu1 %v1533_v13 }
 0x7a8   :  { %666 = vperm.xlu1 %1369, %v607_v34  }
 0x7b0   :  { %1371 = vset.pattern.permute.xlu1 %v1531_v2 }
 0x7d0   :  { %v631_v63 = vpop.permute.xlu2 %630 }
 0x7d1   :  { %v637_v48 = vmul.f32 %v631_v63, %v1574_v5 }
 0x7d3   :  { %v641_v56 = vrot.slane %v637_v48, 7 }
 0x7d9   :  { %v649_v39 = vpop.permute.xlu2 %648 }
 0x7da   :  { %v655_v57 = vmul.f32 %v649_v39, %v1579_v7 }
 0x7dc   :  { %v659_v3 = vrot.slane %v655_v57, 7 }
 0x7e8   :  { %v612_v37 = vpop.permute.xlu0 %611 }
 0x7e9   :  { %v619_v40 = vmul.f32 %v612_v37, %v1572_v4 }
 0x7eb   :  { %v623_v43 = vrot.slane %v619_v40, 7 }
 0x7ed   :  { %v627_v52 = vadd.f32 %v623_v43, %v1584_v11 }
 0x7ef   :  { %v671_v44 = vpop.permute.xlu2 %670  ;;  %v645_v30 = vadd.f32 %v641_v56, %v627_v52  ;;  %v725_v52 = vrot.slane %v1695_v26, 7 }
 0x7f0   :  { %v674_v49 = vmul.f32 %v671_v44, %v1582_v10 }
 0x7f1   :  { %v663_v6 = vadd.f32 %v659_v3, %v645_v30 }
 0x7f2   :  { %v678_v58 = vrot.slane %v674_v49, 7 }
 0x807   :  { %v653_v41 = vpop.permute.xlu0 %652 }
 0x808   :  { %v617_v38 = vpop.permute.xlu1 %616  ;;  %v656_v46 = vmul.f32 %v653_v41, %v1579_v7 }
 0x809   :  { %v620_v59 = vmul.f32 %v617_v38, %v1572_v4 }
 0x80a   :  { %v660_v53 = vrot.slane %v656_v46, 7 }
 0x80b   :  { %v624_v42 = vrot.slane %v620_v59, 7 }
 0x80d   :  { %v628_v50 = vadd.f32 %v624_v42, %v1590_v19 }
 0x811   :  { %v635_v45 = vpop.permute.xlu1 %634 }
 0x812   :  { %v638_v47 = vmul.f32 %v635_v45, %v1574_v5 }
 0x814   :  { %v642_v51 = vrot.slane %v638_v47, 7  ;;  %v726_v47 = vrot.slane %v1700_v32, 7 }
 0x816   :  { %v646_v55 = vadd.f32 %v642_v51, %v628_v50 }
 0x818   :  { %v664_v61 = vadd.f32 %v660_v53, %v646_v55 }
 0x81a   :  { %v682_v62 = vadd.f32 %v678_v58, %v664_v61  ;;  %v667_v0 = vpop.permute.xlu1 %666 }
 0x81b   :  { %v673_v35 = vmul.f32 %v667_v0, %v1582_v10 }
 0x81c   :  { %1463 = vtanh.f32 %v682_v62  ;;  %v1322_v16 = vmul.f32 -1.442695, %v682_v62 }
 0x81d   :  { %v677_v8 = vrot.slane %v673_v35, 7 }
 0x81f   :  { %v681_v9 = vadd.f32 %v677_v8, %v663_v6 }
 0x821   :  { %1465 = vtanh.f32 %v681_v9  ;;  %v1321_v22 = vmul.f32 -1.442695, %v681_v9 }
 0x822   :  { %v1464_v14 = vpop.eup %1463  ;;  %1467 = vpow2.f32 %v1322_v16 }
 0x823   :  { %735 = vrot.lane.b32.xlu2 %v1464_v14, %s1527_s0 }
 0x827   :  { %v1466_v15 = vpop.eup %1465 }
 0x828   :  { %733 = vrot.lane.b32.xlu1 %v1466_v15, %s1527_s0  ;;  %v1468_v17 = vpop.eup %1467 }
 0x829   :  { %v690_v18 = vadd.f32 1.0, %v1468_v17 }
 0x82b   :  { %1469 = vrcp.f32 %v690_v18  ;;  %v717_v28 = vand.u32 2147483648, %v690_v18  ;;  %vm711_vm3 = vweird.f32 %v690_v18  ;;  %v715_v29 = vand.u32 2147483647, %v690_v18 }
 0x82c   :  { %1471 = vpow2.f32 %v1321_v22 }
 0x82d   :  { %v718_v60 = vor.u32 1.1754944e-38, %v717_v28  ;;  %vm716_vm5 = vcmp.eq.f32.partialorder %v715_v29, 8.507059e+37 }
 0x831   :  { %v1470_v20 = vpop.eup %1469 }
 0x832   :  { %v707_v21 = vmul.f32 %v1470_v20, %v690_v18  ;;  %vm712_vm2 = vweird.f32 %v1470_v20  ;;  %v1472_v27 = vpop.eup %1471 }
 0x833   :  { %vm713_vm4 = vmor %vm711_vm3, %vm712_vm2  ;;  %v689_v31 = vadd.f32 1.0, %v1472_v27 }
 0x834   :  { %v708_v23 = vsub.f32 1.0, %v707_v21 }
 0x835   :  { %1473 = vrcp.f32 %v689_v31  ;;  %v702_v40 = vand.u32 2147483648, %v689_v31  ;;  %vm696_vm7 = vweird.f32 %v689_v31  ;;  %v700_v41 = vand.u32 2147483647, %v689_v31 }
 0x836   :  { %v709_v24 = vmul.f32 %v1470_v20, %v708_v23 }
 0x837   :  { %v703_v43 = vor.u32 1.1754944e-38, %v702_v40  ;;  %vm701_vm9 = vcmp.eq.f32.partialorder %v700_v41, 8.507059e+37 }
 0x838   :  { %v710_v25 = vadd.f32 %v1470_v20, %v709_v24 }
 0x83a   :  { %v714_v33 = vsel %vm713_vm4, %v1470_v20, %v710_v25 }
 0x83b   :  { %v719_v54 = vsel %vm716_vm5, %v718_v60, %v714_v33  ;;  %v1474_v63 = vpop.eup %1473 }
 0x83c   :  { %v692_v37 = vmul.f32 %v1474_v63, %v689_v31  ;;  %vm697_vm6 = vweird.f32 %v1474_v63  ;;  %v730_v48 = vmul.f32 %v726_v47, %v719_v54 }
 0x83d   :  { %vm698_vm8 = vmor %vm696_vm7, %vm697_vm6 }
 0x83e   :  { %v693_v38 = vsub.f32 1.0, %v692_v37 }
 0x840   :  { %v694_v39 = vmul.f32 %v1474_v63, %v693_v38 }
 0x842   :  { %v695_v59 = vadd.f32 %v1474_v63, %v694_v39 }
 0x844   :  { %v699_v42 = vsel %vm698_vm8, %v1474_v63, %v695_v59 }
 0x845   :  { %v704_v45 = vsel %vm701_vm9, %v703_v43, %v699_v42 }
 0x846   :  { %v729_v53 = vmul.f32 %v725_v52, %v704_v45 }
 0x87d   :  { %v736_v34 = vpop.permute.xlu2 %735 }
 0x87e   :  { %v740_v36 = vmul.f32 %v736_v34, %v719_v54 }
 0x880   :  { %745 = vrot.lane.b32.xlu1 %v740_v36, %s1528_s1 }
 0x89a   :  { %v734_v44 = vpop.permute.xlu1 %733 }
 0x89b   :  { %v739_v46 = vmul.f32 %v734_v44, %v704_v45 }
 0x89d   :  { %743 = vrot.lane.b32.xlu0 %v739_v46, %s1528_s1 }
 0x8f2   :  { %v746_v49 = vpop.permute.xlu1 %745 }
 0x8f3   :  { %v1727_v50 = vadd.f32 %v746_v49, %v730_v48 }
 0x8f5   :  { %1475 = vtanh.f32 %v1727_v50 }
 0x8fb   :  { %v1476_v51 = vpop.eup %1475 }
 0x8fc   :  { %757 = vrot.lane.b32.xlu0 %v1476_v51, %s1529_s25 }
 0x90f   :  { %v744_v55 = vpop.permute.xlu0 %743 }
 0x910   :  { %v1732_v56 = vadd.f32 %v744_v55, %v729_v53 }
 0x912   :  { %1477 = vtanh.f32 %v1732_v56 }
 0x918   :  { %v1478_v57 = vpop.eup %1477 }
 0x919   :  { %755 = vrot.lane.b32.xlu2 %v1478_v57, %s1529_s25 }
 0x96e   :  { %v758_v61 = vpop.permute.xlu0 %757 }
 0x96f   :  { %v762_v30 = vmul.f32 %v758_v61, %v719_v54 }
 0x973   :  { %v756_v32 = vpop.permute.xlu2 %755 }
 0x974   :  { %v761_v58 = vmul.f32 %v756_v32, %v704_v45 }
 0x976   :  { %802 = vperm.xlu2 %1373, %v761_v58   ;;  %784 = vperm.xlu0 %1372, %v761_v58  }
 0x977   :  { %765 = vperm.xlu1 %1371, %v761_v58  }
 0x97e   :  { %1374 = vset.pattern.permute.xlu2 %v1531_v2  ;;  %1378 = vset.pattern.permute.xlu0 %v1533_v13 }
 0x97f   :  { %1375 = vset.pattern.permute.xlu1 %v1530_v1  ;;  %824 = vperm.xlu0 %1378, %v762_v30  }
 0x980   :  { %788 = vperm.xlu1 %1375, %v762_v30   ;;  %770 = vperm.xlu2 %1374, %v762_v30  }
 0x987   :  { %1382 = vset.pattern.permute.xlu0 %v1531_v2 }
 0x988   :  { %1376 = vset.pattern.permute.xlu1 %v1532_v12  ;;  %1377 = vset.pattern.permute.xlu2 %v1533_v13 }
 0x989   :  { %806 = vperm.xlu1 %1376, %v762_v30   ;;  %820 = vperm.xlu2 %1377, %v761_v58  }
 0x991   :  { %1380 = vset.pattern.permute.xlu1 %v1530_v1  ;;  %1379 = vset.pattern.permute.xlu2 %v1531_v2 }
 0x9d0   :  { %v803_v26 = vpop.permute.xlu2 %802 }
 0x9d1   :  { %v809_v9 = vmul.f32 %v803_v26, %v1579_v7 }
 0x9d3   :  { %v813_v18 = vrot.slane %v809_v9, 7 }
 0x9da   :  { %v771_v62 = vpop.permute.xlu2 %770 }
 0x9db   :  { %v774_v24 = vmul.f32 %v771_v62, %v1572_v4 }
 0x9dd   :  { %v778_v28 = vrot.slane %v774_v24, 7  ;;  %v879_v24 = vrot.slane %v1732_v56, 7 }
 0x9df   :  { %v782_v34 = vadd.f32 %v778_v28, %v1590_v19 }
 0x9e3   :  { %v821_v8 = vpop.permute.xlu2 %820 }
 0x9e4   :  { %v827_v15 = vmul.f32 %v821_v8, %v1582_v10 }
 0x9e6   :  { %v831_v21 = vrot.slane %v827_v15, 7 }
 0x9e8   :  { %v785_v0 = vpop.permute.xlu0 %784 }
 0x9e9   :  { %v766_v3 = vpop.permute.xlu1 %765  ;;  %v791_v6 = vmul.f32 %v785_v0, %v1574_v5 }
 0x9ea   :  { %v773_v35 = vmul.f32 %v766_v3, %v1572_v4 }
 0x9eb   :  { %v795_v17 = vrot.slane %v791_v6, 7 }
 0x9ec   :  { %v777_v14 = vrot.slane %v773_v35, 7 }
 0x9ee   :  { %v781_v16 = vadd.f32 %v777_v14, %v1584_v11 }
 0x9f0   :  { %v799_v20 = vadd.f32 %v795_v17, %v781_v16 }
 0x9f1   :  { %v825_v29 = vpop.permute.xlu0 %824 }
 0x9f2   :  { %v817_v22 = vadd.f32 %v813_v18, %v799_v20  ;;  %v789_v23 = vpop.permute.xlu1 %788  ;;  %v828_v54 = vmul.f32 %v825_v29, %v1582_v10  ;;  %v880_v18 = vrot.slane %v1727_v50, 7 }
 0x9f3   :  { %v792_v27 = vmul.f32 %v789_v23, %v1574_v5 }
 0x9f4   :  { %v835_v25 = vadd.f32 %v831_v21, %v817_v22  ;;  %v832_v38 = vrot.slane %v828_v54, 7 }
 0x9f5   :  { %v796_v31 = vrot.slane %v792_v27, 7 }
 0x9f6   :  { %1479 = vtanh.f32 %v835_v25  ;;  %v1323_v43 = vmul.f32 -1.442695, %v835_v25 }
 0x9f7   :  { %v800_v63 = vadd.f32 %v796_v31, %v782_v34 }
 0x9fb   :  { %v807_v33 = vpop.permute.xlu1 %806 }
 0x9fc   :  { %v1480_v60 = vpop.eup %1479  ;;  %v810_v36 = vmul.f32 %v807_v33, %v1579_v7 }
 0x9fd   :  { %887 = vrot.lane.b32.xlu1 %v1480_v60, %s1527_s0 }
 0x9fe   :  { %v814_v37 = vrot.slane %v810_v36, 7 }
 0xa00   :  { %v818_v39 = vadd.f32 %v814_v37, %v800_v63 }
 0xa02   :  { %v836_v59 = vadd.f32 %v832_v38, %v818_v39 }
 0xa04   :  { %1481 = vtanh.f32 %v836_v59  ;;  %v1324_v41 = vmul.f32 -1.442695, %v836_v59 }
 0xa06   :  { %1483 = vpow2.f32 %v1324_v41 }
 0xa07   :  { %1485 = vpow2.f32 %v1323_v43 }
 0xa0a   :  { %v1482_v40 = vpop.eup %1481 }
 0xa0b   :  { %889 = vrot.lane.b32.xlu2 %v1482_v40, %s1527_s0 }
 0xa0c   :  { %v1484_v42 = vpop.eup %1483 }
 0xa0d   :  { %v844_v44 = vadd.f32 1.0, %v1484_v42  ;;  %v1486_v45 = vpop.eup %1485 }
 0xa0e   :  { %v843_v47 = vadd.f32 1.0, %v1486_v45 }
 0xa0f   :  { %1487 = vrcp.f32 %v844_v44  ;;  %v871_v57 = vand.u32 2147483648, %v844_v44  ;;  %vm865_vm11 = vweird.f32 %v844_v44  ;;  %v869_v32 = vand.u32 2147483647, %v844_v44 }
 0xa10   :  { %1489 = vrcp.f32 %v843_v47  ;;  %v856_v6 = vand.u32 2147483648, %v843_v47  ;;  %vm850_vm15 = vweird.f32 %v843_v47  ;;  %v854_v8 = vand.u32 2147483647, %v843_v47 }
 0xa11   :  { %v872_v30 = vor.u32 1.1754944e-38, %v871_v57  ;;  %vm870_vm13 = vcmp.eq.f32.partialorder %v869_v32, 8.507059e+37 }
 0xa12   :  { %v857_v14 = vor.u32 1.1754944e-38, %v856_v6  ;;  %vm855_vm1 = vcmp.eq.f32.partialorder %v854_v8, 8.507059e+37 }
 0xa15   :  { %v1488_v46 = vpop.eup %1487 }
 0xa16   :  { %v861_v48 = vmul.f32 %v1488_v46, %v844_v44  ;;  %v1490_v51 = vpop.eup %1489  ;;  %vm866_vm10 = vweird.f32 %v1488_v46 }
 0xa17   :  { %v846_v53 = vmul.f32 %v1490_v51, %v843_v47  ;;  %vm867_vm12 = vmor %vm865_vm11, %vm866_vm10  ;;  %vm851_vm14 = vweird.f32 %v1490_v51 }
 0xa18   :  { %v862_v49 = vsub.f32 1.0, %v861_v48  ;;  %vm852_vm0 = vmor %vm850_vm15, %vm851_vm14 }
 0xa19   :  { %v847_v58 = vsub.f32 1.0, %v846_v53 }
 0xa1a   :  { %v863_v52 = vmul.f32 %v1488_v46, %v862_v49 }
 0xa1b   :  { %v848_v26 = vmul.f32 %v1490_v51, %v847_v58 }
 0xa1c   :  { %v864_v55 = vadd.f32 %v1488_v46, %v863_v52 }
 0xa1d   :  { %v849_v35 = vadd.f32 %v1490_v51, %v848_v26 }
 0xa1e   :  { %v868_v61 = vsel %vm867_vm12, %v1488_v46, %v864_v55 }
 0xa1f   :  { %v873_v0 = vsel %vm870_vm13, %v872_v30, %v868_v61  ;;  %v853_v9 = vsel %vm852_vm0, %v1490_v51, %v849_v35 }
 0xa20   :  { %v858_v16 = vsel %vm855_vm1, %v857_v14, %v853_v9  ;;  %v884_v20 = vmul.f32 %v880_v18, %v873_v0 }
 0xa21   :  { %v883_v25 = vmul.f32 %v879_v24, %v858_v16 }
 0xa65   :  { %v890_v62 = vpop.permute.xlu2 %889 }
 0xa66   :  { %v894_v3 = vmul.f32 %v890_v62, %v873_v0 }
 0xa68   :  { %899 = vrot.lane.b32.xlu2 %v894_v3, %s1528_s1 }
 0xa6f   :  { %v888_v15 = vpop.permute.xlu1 %887 }
 0xa70   :  { %v893_v17 = vmul.f32 %v888_v15, %v858_v16 }
 0xa72   :  { %897 = vrot.lane.b32.xlu1 %v893_v17, %s1528_s1 }
 0xac2   :  { %v900_v21 = vpop.permute.xlu2 %899 }
 0xac3   :  { %v1759_v22 = vadd.f32 %v900_v21, %v884_v20 }
 0xac5   :  { %1491 = vtanh.f32 %v1759_v22 }
 0xacb   :  { %v1492_v23 = vpop.eup %1491 }
 0xacc   :  { %911 = vrot.lane.b32.xlu1 %v1492_v23, %s1529_s25 }
 0xae4   :  { %v898_v27 = vpop.permute.xlu1 %897 }
 0xae5   :  { %v1764_v28 = vadd.f32 %v898_v27, %v883_v25 }
 0xae7   :  { %1493 = vtanh.f32 %v1764_v28 }
 0xaed   :  { %v1494_v29 = vpop.eup %1493 }
 0xaee   :  { %909 = vrot.lane.b32.xlu0 %v1494_v29, %s1529_s25 }
 0xb3e   :  { %v912_v50 = vpop.permute.xlu1 %911 }
 0xb3f   :  { %v916_v31 = vmul.f32 %v912_v50, %v873_v0 }
 0xb41   :  { %924 = vperm.xlu0 %1382, %v916_v31  }
 0xb49   :  { %1385 = vset.pattern.permute.xlu0 %v1533_v13 }
 0xb60   :  { %v910_v33 = vpop.permute.xlu0 %909 }
 0xb61   :  { %v915_v60 = vmul.f32 %v910_v33, %v858_v16 }
 0xb63   :  { %974 = vperm.xlu0 %1385, %v915_v60   ;;  %938 = vperm.xlu1 %1380, %v915_v60  }
 0xb64   :  { %919 = vperm.xlu2 %1379, %v915_v60  }
 0xb6b   :  { %1381 = vset.pattern.permute.xlu1 %v1532_v12  ;;  %1387 = vset.pattern.permute.xlu0 %v1531_v2 }
 0xb6c   :  { %1383 = vset.pattern.permute.xlu2 %v1530_v1  ;;  %956 = vperm.xlu1 %1381, %v915_v60  }
 0xb6d   :  { %942 = vperm.xlu2 %1383, %v916_v31  }
 0xb74   :  { %1386 = vset.pattern.permute.xlu1 %v1533_v13 }
 0xb75   :  { %1384 = vset.pattern.permute.xlu2 %v1532_v12  ;;  %978 = vperm.xlu1 %1386, %v916_v31  }
 0xb76   :  { %960 = vperm.xlu2 %1384, %v916_v31  }
 0xb7d   :  { %1390 = vset.pattern.permute.xlu1 %v1531_v2 }
 0xb7e   :  { %1388 = vset.pattern.permute.xlu2 %v1530_v1 }
 0xbb3   :  { %v925_v34 = vpop.permute.xlu0 %924 }
 0xbb4   :  { %v928_v40 = vmul.f32 %v925_v34, %v1572_v4 }
 0xbb6   :  { %v932_v48 = vrot.slane %v928_v40, 7 }
 0xbb8   :  { %v936_v57 = vadd.f32 %v932_v48, %v1590_v19 }
 0xbbe   :  { %v920_v56 = vpop.permute.xlu2 %919 }
 0xbbf   :  { %v927_v63 = vmul.f32 %v920_v56, %v1572_v4 }
 0xbc1   :  { %v931_v38 = vrot.slane %v927_v63, 7 }
 0xbc3   :  { %v935_v42 = vadd.f32 %v931_v38, %v1584_v11 }
 0xbc7   :  { %v943_v54 = vpop.permute.xlu2 %942 }
 0xbc8   :  { %v946_v45 = vmul.f32 %v943_v54, %v1574_v5 }
 0xbca   :  { %v950_v53 = vrot.slane %v946_v45, 7 }
 0xbcc   :  { %v954_v61 = vadd.f32 %v950_v53, %v936_v57 }
 0xbd0   :  { %v961_v43 = vpop.permute.xlu2 %960 }
 0xbd1   :  { %v964_v49 = vmul.f32 %v961_v43, %v1579_v7 }
 0xbd3   :  { %v968_v32 = vrot.slane %v964_v49, 7 }
 0xbd5   :  { %v939_v36 = vpop.permute.xlu1 %938  ;;  %v975_v39 = vpop.permute.xlu0 %974  ;;  %v972_v26 = vadd.f32 %v968_v32, %v954_v61 }
 0xbd6   :  { %v945_v37 = vmul.f32 %v939_v36, %v1574_v5  ;;  %v981_v2 = vmul.f32 %v975_v39, %v1582_v10 }
 0xbd8   :  { %v949_v59 = vrot.slane %v945_v37, 7  ;;  %v985_v51 = vrot.slane %v981_v2, 7 }
 0xbda   :  { %v953_v46 = vadd.f32 %v949_v59, %v935_v42  ;;  %v1033_v42 = vrot.slane %v1764_v28, 7 }
 0xbde   :  { %v957_v41 = vpop.permute.xlu1 %956 }
 0xbdf   :  { %v963_v44 = vmul.f32 %v957_v41, %v1579_v7 }
 0xbe1   :  { %v967_v47 = vrot.slane %v963_v44, 7 }
 0xbe3   :  { %v971_v52 = vadd.f32 %v967_v47, %v953_v46  ;;  %v1034_v46 = vrot.slane %v1759_v22, 7 }
 0xbe5   :  { %v989_v55 = vadd.f32 %v985_v51, %v971_v52 }
 0xbe7   :  { %1495 = vtanh.f32 %v989_v55  ;;  %v979_v58 = vpop.permute.xlu1 %978  ;;  %v1325_v6 = vmul.f32 -1.442695, %v989_v55 }
 0xbe8   :  { %v982_v30 = vmul.f32 %v979_v58, %v1582_v10 }
 0xbea   :  { %v986_v62 = vrot.slane %v982_v30, 7 }
 0xbec   :  { %v990_v0 = vadd.f32 %v986_v62, %v972_v26 }
 0xbed   :  { %v1496_v3 = vpop.eup %1495 }
 0xbee   :  { %1497 = vtanh.f32 %v990_v0  ;;  %1041 = vrot.lane.b32.xlu2 %v1496_v3, %s1527_s0  ;;  %v1326_v17 = vmul.f32 -1.442695, %v990_v0 }
 0xbef   :  { %1499 = vpow2.f32 %v1325_v6 }
 0xbf4   :  { %v1498_v35 = vpop.eup %1497 }
 0xbf5   :  { %1043 = vrot.lane.b32.xlu1 %v1498_v35, %s1527_s0  ;;  %v1500_v8 = vpop.eup %1499 }
 0xbf6   :  { %v997_v9 = vadd.f32 1.0, %v1500_v8 }
 0xbf8   :  { %1501 = vrcp.f32 %v997_v9  ;;  %v1010_v21 = vand.u32 2147483648, %v997_v9  ;;  %vm1004_vm3 = vweird.f32 %v997_v9  ;;  %v1008_v23 = vand.u32 2147483647, %v997_v9 }
 0xbf9   :  { %1503 = vpow2.f32 %v1326_v17 }
 0xbfa   :  { %v1011_v27 = vor.u32 1.1754944e-38, %v1010_v21  ;;  %vm1009_vm5 = vcmp.eq.f32.partialorder %v1008_v23, 8.507059e+37 }
 0xbfe   :  { %v1502_v14 = vpop.eup %1501 }
 0xbff   :  { %v1000_v15 = vmul.f32 %v1502_v14, %v997_v9  ;;  %vm1005_vm2 = vweird.f32 %v1502_v14  ;;  %v1504_v24 = vpop.eup %1503 }
 0xc00   :  { %vm1006_vm4 = vmor %vm1004_vm3, %vm1005_vm2  ;;  %v998_v29 = vadd.f32 1.0, %v1504_v24  ;;  %vm1258_vm2 = vcmask 1043456   ;;  %vm1251_vm3 = vcmask 1041409  }
 0xc01   :  { %v1001_v16 = vsub.f32 1.0, %v1000_v15 }
 0xc02   :  { %1505 = vrcp.f32 %v998_v29  ;;  %v1025_v63 = vand.u32 2147483648, %v998_v29  ;;  %vm1019_vm7 = vweird.f32 %v998_v29  ;;  %v1023_v37 = vand.u32 2147483647, %v998_v29 }
 0xc03   :  { %v1002_v18 = vmul.f32 %v1502_v14, %v1001_v16 }
 0xc04   :  { %v1026_v39 = vor.u32 1.1754944e-38, %v1025_v63  ;;  %vm1024_vm9 = vcmp.eq.f32.partialorder %v1023_v37, 8.507059e+37 }
 0xc05   :  { %v1003_v20 = vadd.f32 %v1502_v14, %v1002_v18 }
 0xc07   :  { %v1007_v25 = vsel %vm1006_vm4, %v1502_v14, %v1003_v20  ;;  %vm1255_vm4 = vcmask 31744  }
 0xc08   :  { %v1012_v31 = vsel %vm1009_vm5, %v1011_v27, %v1007_v25  ;;  %v1506_v60 = vpop.eup %1505  ;;  %vm1304_vm5 = vcmask 1024  }
 0xc09   :  { %v1015_v56 = vmul.f32 %v1506_v60, %v998_v29  ;;  %vm1020_vm6 = vweird.f32 %v1506_v60  ;;  %v1037_v43 = vmul.f32 %v1033_v42, %v1012_v31 }
 0xc0a   :  { %vm1021_vm8 = vmor %vm1019_vm7, %vm1020_vm6 }
 0xc0b   :  { %v1016_v34 = vsub.f32 1.0, %v1015_v56 }
 0xc0d   :  { %v1017_v54 = vmul.f32 %v1506_v60, %v1016_v34 }
 0xc0f   :  { %v1018_v36 = vadd.f32 %v1506_v60, %v1017_v54 }
 0xc11   :  { %v1022_v38 = vsel %vm1021_vm8, %v1506_v60, %v1018_v36 }
 0xc12   :  { %v1027_v40 = vsel %vm1024_vm9, %v1026_v39, %v1022_v38 }
 0xc13   :  { %v1038_v47 = vmul.f32 %v1034_v46, %v1027_v40 }
 0xc48   :  { %v1042_v50 = vpop.permute.xlu2 %1041 }
 0xc49   :  { %v1047_v33 = vmul.f32 %v1042_v50, %v1012_v31 }
 0xc4b   :  { %1051 = vrot.lane.b32.xlu2 %v1047_v33, %s1528_s1 }
 0xc67   :  { %v1044_v59 = vpop.permute.xlu1 %1043 }
 0xc68   :  { %v1048_v41 = vmul.f32 %v1044_v59, %v1027_v40 }
 0xc6a   :  { %1053 = vrot.lane.b32.xlu0 %v1048_v41, %s1528_s1 }
 0xca5   :  { %v1052_v2 = vpop.permute.xlu2 %1051 }
 0xca6   :  { %v1791_v44 = vadd.f32 %v1052_v2, %v1037_v43 }
 0xca8   :  { %1507 = vtanh.f32 %v1791_v44 }
 0xcae   :  { %v1508_v45 = vpop.eup %1507 }
 0xcaf   :  { %1063 = vrot.lane.b32.xlu1 %v1508_v45, %s1529_s25 }
 0xcdc   :  { %v1054_v48 = vpop.permute.xlu0 %1053 }
 0xcdd   :  { %v1796_v49 = vadd.f32 %v1054_v48, %v1038_v47 }
 0xcdf   :  { %1509 = vtanh.f32 %v1796_v49 }
 0xce5   :  { %v1510_v51 = vpop.eup %1509 }
 0xce6   :  { %1065 = vrot.lane.b32.xlu2 %v1510_v51, %s1529_s25 }
 0xd21   :  { %v1064_v28 = vpop.permute.xlu1 %1063 }
 0xd22   :  { %v1069_v52 = vmul.f32 %v1064_v28, %v1012_v31 }
 0xd24   :  { %1073 = vperm.xlu0 %1387, %v1069_v52   ;;  %1092 = vperm.xlu2 %1388, %v1069_v52  }
 0xd2c   :  { %1389 = vset.pattern.permute.xlu2 %v1532_v12  ;;  %1392 = vset.pattern.permute.xlu0 %v1532_v12 }
 0xd2d   :  { %1110 = vperm.xlu2 %1389, %v1069_v52  }
 0xd35   :  { %1394 = vset.pattern.permute.xlu2 %v1533_v13 }
 0xd40   :  { %v1066_v22 = vpop.permute.xlu2 %1065 }
 0xd41   :  { %v1070_v53 = vmul.f32 %v1066_v22, %v1027_v40 }
 0xd43   :  { %1132 = vperm.xlu2 %1394, %v1070_v53   ;;  %1114 = vperm.xlu0 %1392, %v1070_v53  }
 0xd44   :  { %1078 = vperm.xlu1 %1390, %v1070_v53  }
 0xd4b   :  { %1395 = vset.pattern.permute.xlu0 %v1533_v13 }
 0xd4c   :  { %1391 = vset.pattern.permute.xlu1 %v1530_v1 }
 0xd4d   :  { %1096 = vperm.xlu1 %1391, %v1070_v53  }
 0xd55   :  { %1393 = vset.pattern.permute.xlu1 %v1533_v13 }
 0xd56   :  { %1128 = vperm.xlu1 %1393, %v1069_v52  }
 0xd7e   :  { %v1093_v55 = vpop.permute.xlu2 %1092 }
 0xd7f   :  { %v1099_v13 = vmul.f32 %v1093_v55, %v1574_v5 }
 0xd81   :  { %v1103_v16 = vrot.slane %v1099_v13, 7 }
 0xd87   :  { %v1111_v12 = vpop.permute.xlu2 %1110 }
 0xd88   :  { %v1117_v17 = vmul.f32 %v1111_v12, %v1579_v7 }
 0xd8a   :  { %v1121_v25 = vrot.slane %v1117_v17, 7  ;;  %v1241_v17 = vld [vmem:[%s1887_s3 + $0x70] sm:$0xff] }
 0xd96   :  { %v1074_v57 = vpop.permute.xlu0 %1073 }
 0xd97   :  { %v1081_v61 = vmul.f32 %v1074_v57, %v1572_v4 }
 0xd99   :  { %v1085_v62 = vrot.slane %v1081_v61, 7 }
 0xd9b   :  { %v1089_v14 = vadd.f32 %v1085_v62, %v1584_v11 }
 0xd9d   :  { %v1133_v0 = vpop.permute.xlu2 %1132  ;;  %v1107_v21 = vadd.f32 %v1103_v16, %v1089_v14  ;;  %v1242_v16 = vld [vmem:[%s1887_s3 + $0x78] sm:$0xff] }
 0xd9e   :  { %v1136_v6 = vmul.f32 %v1133_v0, %v1582_v10  ;;  %1284 = vmatpush.msra.mxu2 %v1242_v16 }
 0xd9f   :  { %v1125_v27 = vadd.f32 %v1121_v25, %v1107_v21  ;;  %v1238_v21 = vld [vmem:[%s1887_s3 + $0x58] sm:$0xff]  ;;  %v1235_v25 = vld [vmem:[%s1887_s3 + $0x40] sm:$0xff] }
 0xda0   :  { %v1140_v18 = vrot.slane %v1136_v6, 7  ;;  %1285 = vmatpush.msra.mxu2 %v1241_v17 }
 0xdb5   :  { %v1115_v30 = vpop.permute.xlu0 %1114 }
 0xdb6   :  { %v1079_v32 = vpop.permute.xlu1 %1078  ;;  %v1118_v35 = vmul.f32 %v1115_v30, %v1579_v7 }
 0xdb7   :  { %v1082_v58 = vmul.f32 %v1079_v32, %v1572_v4  ;;  %v1188_v32 = vrot.slane %v1796_v49, 7  ;;  %v1225_v49 = vld [vmem:[%s1886_s2] sm:$0xf] }
 0xdb8   :  { %v1122_v15 = vrot.slane %v1118_v35, 7  ;;  %1329 = vmatpush.msk.msra.mxu1 %vm1258_vm2, %v1225_v49 }
 0xdb9   :  { %v1086_v26 = vrot.slane %v1082_v58, 7 }
 0xdbb   :  { %v1090_v8 = vadd.f32 %v1086_v26, %v1590_v19  ;;  %v1187_v26 = vrot.slane %v1791_v44, 7 }
 0xdbf   :  { %v1097_v3 = vpop.permute.xlu1 %1096 }
 0xdc0   :  { %v1100_v1 = vmul.f32 %v1097_v3, %v1574_v5 }
 0xdc2   :  { %v1104_v9 = vrot.slane %v1100_v1, 7 }
 0xdc4   :  { %v1108_v4 = vadd.f32 %v1104_v9, %v1090_v8 }
 0xdc6   :  { %v1126_v20 = vadd.f32 %v1122_v15, %v1108_v4 }
 0xdc8   :  { %v1144_v23 = vadd.f32 %v1140_v18, %v1126_v20  ;;  %v1129_v24 = vpop.permute.xlu1 %1128  ;;  %v1240_v18 = vld [vmem:[%s1887_s3 + $0x68] sm:$0xff]  ;;  %v1239_v20 = vld [vmem:[%s1887_s3 + $0x60] sm:$0xff] }
 0xdc9   :  { %v1135_v5 = vmul.f32 %v1129_v24, %v1582_v10  ;;  %1286 = vmatpush.msra.mxu2 %v1240_v18  ;;  %v1236_v24 = vld [vmem:[%s1887_s3 + $0x48] sm:$0xff] }
 0xdca   :  { %1511 = vtanh.f32 %v1144_v23  ;;  %v1328_v7 = vmul.f32 -1.442695, %v1144_v23  ;;  %v1237_v23 = vld [vmem:[%s1887_s3 + $0x50] sm:$0xff] }
 0xdcb   :  { %v1139_v29 = vrot.slane %v1135_v5, 7  ;;  %1287 = vmatpush.msra.mxu2 %v1239_v20  ;;  %v1234_v5 = vld [vmem:[%s1887_s3 + $0x38] sm:$0xff] }
 0xdcd   :  { %v1143_v19 = vadd.f32 %v1139_v29, %v1125_v27  ;;  %1288 = vmatpush.msra.mxu2 %v1238_v21  ;;  %v1233_v27 = vld [vmem:[%s1887_s3 + $0x30] sm:$0xff]  ;;  %v1232_v29 = vld [vmem:[%s1887_s3 + $0x28] sm:$0xff] }
 0xdcf   :  { %1513 = vtanh.f32 %v1143_v19  ;;  %v1327_v34 = vmul.f32 -1.442695, %v1143_v19  ;;  %1289 = vmatpush.msra.mxu2 %v1237_v23  ;;  %v1231_v19 = vld [vmem:[%s1887_s3 + $0x20] sm:$0xff] }
 0xdd0   :  { %v1512_v50 = vpop.eup %1511  ;;  %1515 = vpow2.f32 %v1328_v7  ;;  %v1229_v7 = vld [vmem:[%s1887_s3 + $0x10] sm:$0xff] }
 0xdd1   :  { %1197 = vrot.lane.b32.xlu2 %v1512_v50, %s1527_s0  ;;  %1290 = vmatpush.msra.mxu2 %v1236_v24  ;;  %v1230_v50 = vld [vmem:[%s1887_s3 + $0x18] sm:$0xff] }
 0xdd3   :  { %1291 = vmatpush.msra.mxu2 %v1235_v25 }
 0xdd5   :  { %v1514_v11 = vpop.eup %1513  ;;  %1292 = vmatpush.msra.mxu2 %v1234_v5 }
 0xdd6   :  { %1195 = vrot.lane.b32.xlu1 %v1514_v11, %s1527_s0  ;;  %v1516_v31 = vpop.eup %1515 }
 0xdd7   :  { %v1152_v33 = vadd.f32 1.0, %v1516_v31  ;;  %1293 = vmatpush.msra.mxu2 %v1233_v27  ;;  %v1228_v31 = vld [vmem:[%s1887_s3 + $0x8] sm:$0xff] }
 0xdd9   :  { %1517 = vrcp.f32 %v1152_v33  ;;  %v1179_v37 = vand.u32 2147483648, %v1152_v33  ;;  %vm1173_vm11 = vweird.f32 %v1152_v33  ;;  %v1177_v38 = vand.u32 2147483647, %v1152_v33  ;;  %1294 = vmatpush.msra.mxu2 %v1232_v29 }
 0xdda   :  { %1519 = vpow2.f32 %v1327_v34 }
 0xddb   :  { %v1180_v40 = vor.u32 1.1754944e-38, %v1179_v37  ;;  %vm1178_vm13 = vcmp.eq.f32.partialorder %v1177_v38, 8.507059e+37  ;;  %1295 = vmatpush.msra.mxu2 %v1231_v19 }
 0xddd   :  { %1296 = vmatpush.msra.mxu2 %v1230_v50 }
 0xddf   :  { %v1518_v60 = vpop.eup %1517  ;;  %1297 = vmatpush.msra.mxu2 %v1229_v7 }
 0xde0   :  { %v1169_v56 = vmul.f32 %v1518_v60, %v1152_v33  ;;  %vm1174_vm10 = vweird.f32 %v1518_v60  ;;  %v1520_v63 = vpop.eup %1519  ;;  %v1227_v33 = vld [vmem:[%s1887_s3] sm:$0xff] }
 0xde1   :  { %vm1175_vm12 = vmor %vm1173_vm11, %vm1174_vm10  ;;  %v1151_v39 = vadd.f32 1.0, %v1520_v63  ;;  %1298 = vmatpush.msra.mxu2 %v1228_v31 }
 0xde2   :  { %v1170_v10 = vsub.f32 1.0, %v1169_v56 }
 0xde3   :  { %1521 = vrcp.f32 %v1151_v39  ;;  %v1164_v51 = vand.u32 2147483648, %v1151_v39  ;;  %vm1158_vm15 = vweird.f32 %v1151_v39  ;;  %v1162_v28 = vand.u32 2147483647, %v1151_v39  ;;  %1299 = vmatpush.msra.mxu2 %v1227_v33 }
 0xde4   :  { %v1171_v54 = vmul.f32 %v1518_v60, %v1170_v10 }
 0xde5   :  { %v1165_v22 = vor.u32 1.1754944e-38, %v1164_v51  ;;  %vm1163_vm1 = vcmp.eq.f32.partialorder %v1162_v28, 8.507059e+37 }
 0xde6   :  { %v1172_v36 = vadd.f32 %v1518_v60, %v1171_v54  ;;  %v1398_v54 = vld [vmem:[%s1887_s3 + $0x80] ss:$0 sm:$0xff] }
 0xde8   :  { %v1176_v59 = vsel %vm1175_vm12, %v1518_v60, %v1172_v36  ;;  %v1397_v60 = vld [vmem:[%s1886_s2 + $0x4] ss:$0 sm:$0xff] }
 0xde9   :  { %v1181_v42 = vsel %vm1178_vm13, %v1180_v40, %v1176_v59  ;;  %v1522_v2 = vpop.eup %1521 }
 0xdea   :  { %v1154_v45 = vmul.f32 %v1522_v2, %v1151_v39  ;;  %vm1159_vm14 = vweird.f32 %v1522_v2  ;;  %v1192_v12 = vmul.f32 %v1188_v32, %v1181_v42 }
 0xdeb   :  { %vm1160_vm0 = vmor %vm1158_vm15, %vm1159_vm14 }
 0xdec   :  { %v1155_v46 = vsub.f32 1.0, %v1154_v45 }
 0xdee   :  { %v1156_v47 = vmul.f32 %v1522_v2, %v1155_v46 }
 0xdf0   :  { %v1157_v48 = vadd.f32 %v1522_v2, %v1156_v47 }
 0xdf2   :  { %v1161_v52 = vsel %vm1160_vm0, %v1522_v2, %v1157_v48 }
 0xdf3   :  { %v1166_v55 = vsel %vm1163_vm1, %v1165_v22, %v1161_v52 }
 0xdf4   :  { %v1191_v62 = vmul.f32 %v1187_v26, %v1166_v55 }
 0xe2b   :  { %v1198_v41 = vpop.permute.xlu2 %1197 }
 0xe2c   :  { %v1202_v43 = vmul.f32 %v1198_v41, %v1181_v42 }
 0xe2e   :  { %1207 = vrot.lane.b32.xlu1 %v1202_v43, %s1528_s1 }
 0xe48   :  { %v1196_v53 = vpop.permute.xlu1 %1195 }
 0xe49   :  { %v1201_v57 = vmul.f32 %v1196_v53, %v1166_v55 }
 0xe4b   :  { %1205 = vrot.lane.b32.xlu0 %v1201_v57, %s1528_s1 }
 0xea0   :  { %v1208_v58 = vpop.permute.xlu1 %1207 }
 0xea1   :  { %v1212_v61 = vadd.f32 %v1208_v58, %v1192_v12 }
 0xea3   :  { %1523 = vtanh.f32 %v1212_v61 }
 0xea9   :  { %v1524_v30 = vpop.eup %1523 }
 0xeaa   :  { %1219 = vrot.lane.b32.xlu0 %v1524_v30, %s1529_s25 }
 0xebd   :  { %v1206_v0 = vpop.permute.xlu0 %1205 }
 0xebe   :  { %v1211_v3 = vadd.f32 %v1206_v0, %v1191_v62 }
 0xec0   :  { %1525 = vtanh.f32 %v1211_v3 }
 0xec6   :  { %v1526_v35 = vpop.eup %1525 }
 0xec7   :  { %1217 = vrot.lane.b32.xlu2 %v1526_v35, %s1529_s25 }
 0xf1c   :  { %v1220_v1 = vpop.permute.xlu0 %1219 }
 0xf1d   :  { %v1224_v13 = vmul.f32 %v1220_v1, %v1181_v42 }
 0xf1f   :  { %v1245_v8 = vmax.f32 %v1224_v13, 0.0 }
 0xf21   :  { %v1218_v6 = vpop.permute.xlu2 %1217  ;;  %v1250_v44 = vrot.slane %v1245_v8, 6 }
 0xf22   :  { %v1223_v9 = vmul.f32 %v1218_v6, %v1166_v55 }
 0xf24   :  { %v1244_v14 = vmax.f32 %v1223_v9, 0.0 }
 0xf26   :  { %v1249_v15 = vrot.slane %v1244_v14, 7 }
 0xf28   :  { %v1252_v4 = vsel %vm1251_vm3, %v1250_v44, %v1249_v15 }
 0xf29   :  { %1253 = vrot.lane.b32.xlu1 %v1252_v4, %s1534_s28 }
 0xf9b   :  { %v1254_v11 = vpop.permute.xlu1 %1253 }
 0xf9c   :  { %1330 = vmatmul.msk.f32.vlgmr.msra.gmra.mxu1 %vm1255_vm4, %v1254_v11 }
0x1019   :  { %v1279_v56 = vpop.f32.mrf.mxu1 }
0x101a   :  { %v1280_v34 = vadd.f32 %v1397_v60, %v1279_v56 }
0x101c   :  { %v1282_v10 = vmax.f32 %v1280_v34, 0.0 }
0x101e   :  { %1300 = vmatmul.f32.vlgmr.msra.gmra.mxu2 %v1282_v10 }
0x10a1   :  { %v1301_v36 = vpop.f32.mrf.mxu2 }
0x10a2   :  { %v1302_v63 = vadd.f32 %v1398_v54, %v1301_v36 }
0x10a4   :  { %1305 = vst.msk [vmem:[%s1888_s4] sm:$0x3] %vm1304_vm5, %v1302_v63 }

</bundles_post_ra>
